<compile_context>
chip_gen: v6e
topology: v6e:2x2x1
jax: 0.10.0
libtpu: 0.0.40
codegen_flags: <defaults>
</compile_context>

<pallas_src>
import functools

import jax
import jax.numpy as jnp
from jax.experimental import pallas as pl
from jax.experimental.pallas import tpu as pltpu


def _round_up(v, m):
    return (v + m - 1) // m * m


# ------------------------- parameter initialization --------------------------

def init_params(key, *, in_dim, embbed_dim, num_embbeds, num_classes,
                num_perceivers, num_latent_transformers):
    f32 = jnp.float32
    D, C = embbed_dim, in_dim
    keys = iter(jax.random.split(key, 256))

    def dense(shape, scale=0.02):
        return scale * jax.random.normal(next(keys), shape, dtype=f32)

    def ln_pack(width, n_norms=1):
        rows = []
        for _ in range(n_norms):
            rows.append(jnp.ones((1, width), f32))    # gamma
            rows.append(jnp.zeros((1, width), f32))   # beta
        return jnp.concatenate(rows, axis=0)

    perceivers = []
    for _ in range(num_perceivers):
        cross = {
            "ln_lat": ln_pack(D),                      # (2, D)  [gamma; beta]
            "ln_ctx": ln_pack(C),                      # (2, C)
            "w_q": dense((D, D)),
            "w_kv": dense((C, 2 * D)),                 # fused K|V projection
            "w_o": dense((D, D)),
            "b_qo": jnp.zeros((2, D), f32),            # rows: [b_q, b_o]
            "b_kv": jnp.zeros((1, 2 * D), f32),
        }
        latent = []
        for _ in range(num_latent_transformers):
            latent.append({
                "ln": ln_pack(D, 2),                   # rows: [g1, b1, g2, b2]
                "w_qkv": dense((D, 3 * D)),            # fused Q|K|V projection
                "b_qkv": jnp.zeros((1, 3 * D), f32),
                "w_o": dense((D, D)),
                "b_o2": jnp.zeros((2, D), f32),        # rows: [b_o, b_mlp2]
                "w_1": dense((D, 2 * D)),
                "b_1": jnp.zeros((1, 2 * D), f32),
                "w_2": dense((2 * D, D)),
            })
        perceivers.append({"cross": cross, "latent": latent})

    return {
        "embeddings": jax.random.normal(next(keys), (1, num_embbeds, D), dtype=f32),
        "head_w": dense((D * num_embbeds, num_classes)),
        "head_b": jnp.zeros((1, num_classes), f32),
        "perceivers": perceivers,
    }


# ------------------------------ slab packing ----------------------------------

def pack_params(params, *, in_dim, embbed_dim, mm_dtype):
    """Pack all parameters into two lane-dense slabs + a static int layout.

    mm_slab : (num_blocks*LW, LW) mm_dtype  -- one (LW,LW) zero-padded block
              per matmul weight (K rows / output lanes zero-padded).
    vec_slab: (rows, LW) float32            -- one 128-lane row per LN
              gamma/beta / bias / embedding token.
    """
    f32 = jnp.float32
    C, D = in_dim, embbed_dim
    LW = _round_up(max(C, 3 * D, 8), 128)      # lane width of every slab row

    mm_blocks, vec_rows = [], []

    def add_block(w):                           # w: (K, Nout)
        k, n = w.shape
        blk = jnp.zeros((LW, LW), f32).at[:k, :n].set(w.astype(f32))
        mm_blocks.append(blk)
        return len(mm_blocks) - 1

    def add_row(v):                             # v: (width,)
        v = jnp.asarray(v, f32).reshape(-1)
        vec_rows.append(jnp.zeros((LW,), f32).at[:v.shape[0]].set(v))
        return len(vec_rows) - 1

    layout = {"LW": LW}
    emb = params["embeddings"][0]               # (N, D)
    layout["emb_row"] = len(vec_rows)
    for n in range(emb.shape[0]):
        add_row(emb[n])

    p_layouts = []
    for per in params["perceivers"]:
        cp = per["cross"]
        cl = {}
        cl["wq"] = add_block(cp["w_q"])
        cl["wkv"] = add_block(cp["w_kv"])
        cl["wo"] = add_block(cp["w_o"])
        cl["ln_lat"] = add_row(cp["ln_lat"][0]); add_row(cp["ln_lat"][1])
        cl["ln_ctx"] = add_row(cp["ln_ctx"][0]); add_row(cp["ln_ctx"][1])
        cl["b_q"] = add_row(cp["b_qo"][0])
        cl["b_o"] = add_row(cp["b_qo"][1])
        cl["b_kv"] = add_row(cp["b_kv"][0])
        lt_layouts = []
        for tp in per["latent"]:
            lt = {}
            lt["wqkv"] = add_block(tp["w_qkv"])
            lt["wo"] = add_block(tp["w_o"])
            lt["w1"] = add_block(tp["w_1"])
            lt["w2"] = add_block(tp["w_2"])
            lt["ln1"] = add_row(tp["ln"][0]); add_row(tp["ln"][1])
            lt["ln2"] = add_row(tp["ln"][2]); add_row(tp["ln"][3])
            lt["b_qkv"] = add_row(tp["b_qkv"][0])
            lt["b_o"] = add_row(tp["b_o2"][0])
            lt["b_2"] = add_row(tp["b_o2"][1])
            lt["b_1"] = add_row(tp["b_1"][0])
            lt_layouts.append(lt)
        p_layouts.append({"cross": cl, "latent": lt_layouts})
    layout["perceivers"] = p_layouts

    mm_slab = jnp.concatenate(mm_blocks, axis=0).astype(mm_dtype)
    pad = _round_up(len(vec_rows), 8) - len(vec_rows)
    vec_slab = jnp.stack(vec_rows + [jnp.zeros((LW,), f32)] * pad, axis=0)
    return mm_slab, vec_slab, layout


# ------------------------------ fused kernel ---------------------------------

def _make_fused_kernel(layout, *, bt, S, C, N, D, num_heads, num_latent_heads,
                       mm_dtype):
    f32 = jnp.float32
    LW = layout["LW"]
    n_perceivers = len(layout["perceivers"])

    def mm(a, w):
        # MXU matmul: operands in mm_dtype (bf16 by default), f32 accumulation.
        return jnp.dot(a.astype(w.dtype), w, preferred_element_type=f32)

    def layernorm(v, width, gamma, beta, eps=1e-5):
        # v is zero-padded beyond `width` lanes, gamma/beta zero-padded too, so
        # sum-based mean/variance over LW lanes equal the true statistics and
        # the padding lanes of the output stay exactly zero.
        inv_w = 1.0 / float(width)
        mu = jnp.sum(v, axis=-1, keepdims=True) * inv_w
        var = jnp.sum(v * v, axis=-1, keepdims=True) * inv_w - mu * mu
        return (v - mu) * jax.lax.rsqrt(var + eps) * gamma + beta

    def heads(src, base, t, nh, dh):
        # Build the head-batched layout (nh*bt, t, dh), rows ordered (head, b).
        parts = [src[:, base + h * dh: base + (h + 1) * dh].reshape(bt, t, dh)
                 for h in range(nh)]
        out = parts[0] if nh == 1 else jnp.concatenate(parts, axis=0)
        return out.astype(mm_dtype)

    def mha(q_src, q_off, k_src, k_off, v_src, v_off, wo_heads, *, tq, tk, nh,
            dh, exact):
        """Fused multi-head attention over the merged (head x batch) axis."""
        qg = heads(q_src, q_off, tq, nh, dh)               # (nh*bt, tq, dh)
        kg = heads(k_src, k_off, tk, nh, dh)
        vg = heads(v_src, v_off, tk, nh, dh)
        s = jnp.einsum("gqe,gke->gqk", qg, kg,
                       preferred_element_type=f32) * (dh ** -0.5)
        mx = jnp.max(s, axis=-1, keepdims=True)
        e = jnp.exp(s - mx)
        den = jnp.sum(e, axis=-1, keepdims=True)
        if exact:                        # exact softmax on the energy path
            p = e / den
        else:                            # EUP approx reciprocal elsewhere
            p = e * pl.reciprocal(den, approx=True)
        o = jnp.einsum("gqk,gke->gqe", p.astype(mm_dtype), vg,
                       preferred_element_type=f32)          # (nh*bt, tq, dh)
        # Regroup as (nh, bt*tq, dh) (pure reshape; identity when bt == 1) and
        # apply the output projection as ONE batched einsum over heads, then
        # sum head contributions — no lane-concat of dh-wide chunks.
        o = o.reshape(nh, bt * tq, dh)
        proj = jnp.einsum("hme,heo->hmo", o.astype(mm_dtype), wo_heads,
                          preferred_element_type=f32)       # (nh, bt*tq, LW)
        out = proj[0]
        for h in range(1, nh):
            out = out + proj[h]
        return out, p                    # out: (bt*tq, LW) f32; p: (nh*bt, tq, tk)

    def kernel(x_ref, mm_ref, vec_ref, lat_ref, energy_ref):
        def wblk(i):                     # (LW, LW) weight block view
            return mm_ref[i * LW:(i + 1) * LW, :]

        def vrow(r):                     # (1, LW) vector row
            return vec_ref[r:r + 1, :]

        # Context tokens for this batch tile, lane-padded: (bt*S, LW) f32.
        ctx = x_ref[...].reshape(bt * S, LW)
        # Latents: broadcast learned embeddings over the batch tile.
        emb = vec_ref[layout["emb_row"]:layout["emb_row"] + N, :]   # (N, LW)
        lat = jnp.broadcast_to(emb[None], (bt, N, LW)).reshape(bt * N, LW)

        for p_idx, per in enumerate(layout["perceivers"]):
            # ---- cross attention: latents attend to the input context ----
            cl = per["cross"]
            dh_c = D // num_heads
            h_lat = layernorm(lat, D, vrow(cl["ln_lat"]), vrow(cl["ln_lat"] + 1))
            h_ctx = layernorm(ctx, C, vrow(cl["ln_ctx"]), vrow(cl["ln_ctx"] + 1))
            q = mm(h_lat, wblk(cl["wq"])) + vrow(cl["b_q"])
            kv = mm(h_ctx, wblk(cl["wkv"])) + vrow(cl["b_kv"])
            wo_heads = wblk(cl["wo"])[:D, :].reshape(num_heads, dh_c, LW)
            attn, probs = mha(q, 0, kv, 0, kv, D, wo_heads, tq=N, tk=S,
                              nh=num_heads, dh=dh_c, exact=True)
            lat = lat + attn + vrow(cl["b_o"])

            if p_idx == n_perceivers - 1:
                # Only the last perceiver's attention map is returned by the
                # reference module; earlier writes would be dead work.
                parts = [probs[h * bt:(h + 1) * bt] for h in range(num_heads)]
                eng = parts[0] if num_heads == 1 else jnp.concatenate(parts, axis=1)
                if LW > S:               # lane-pad to a dense 128-lane store
                    eng = jnp.concatenate(
                        [eng, jnp.zeros((bt, num_heads * N, LW - S), f32)],
                        axis=-1)
                energy_ref[...] = eng

            # ---- latent self-attention transformer blocks ----
            dh_l = D // num_latent_heads
            for lt in per["latent"]:
                h1 = layernorm(lat, D, vrow(lt["ln1"]), vrow(lt["ln1"] + 1))
                qkv = mm(h1, wblk(lt["wqkv"])) + vrow(lt["b_qkv"])
                wo_heads = wblk(lt["wo"])[:D, :].reshape(num_latent_heads, dh_l, LW)
                attn, _ = mha(qkv, 0, qkv, D, qkv, 2 * D, wo_heads, tq=N, tk=N,
                              nh=num_latent_heads, dh=dh_l, exact=False)
                lat = lat + attn + vrow(lt["b_o"])
                h2 = layernorm(lat, D, vrow(lt["ln2"]), vrow(lt["ln2"] + 1))
                # TODO(synk): Perceiver MLP activation unknown; ReLU assumed.
                m1 = jnp.maximum(mm(h2, wblk(lt["w1"])) + vrow(lt["b_1"]), 0.0)
                lat = lat + mm(m1, wblk(lt["w2"])) + vrow(lt["b_2"])

        lat_ref[...] = lat.reshape(bt, N, LW)       # lane-dense final latents

    return kernel


# --------------------------------- forward -----------------------------------

def constituentnet_perceiver_forward(params, x, *, num_heads, num_latent_heads,
                                     mm_dtype=jnp.bfloat16, batch_tile=1):
    """Fused Pallas forward pass.  Returns (log_probs, energy)."""
    B, S, C = x.shape
    emb = params["embeddings"]
    N, D = emb.shape[1], emb.shape[2]
    H = num_heads
    bt = batch_tile
    assert B % bt == 0
    assert D % num_heads == 0 and D % num_latent_heads == 0

    mm_slab, vec_slab, layout = pack_params(
        params, in_dim=C, embbed_dim=D, mm_dtype=mm_dtype)
    LW = layout["LW"]
    assert S <= LW

    # Lane-pad the input once host-side so the kernel sees dense 128-lane rows.
    x_p = jnp.zeros((B, S, LW), jnp.float32).at[:, :, :C].set(x.astype(jnp.float32))

    kernel = _make_fused_kernel(
        layout, bt=bt, S=S, C=C, N=N, D=D,
        num_heads=H, num_latent_heads=num_latent_heads, mm_dtype=mm_dtype)

    out_shape = (
        jax.ShapeDtypeStruct((B, N, LW), jnp.float32),      # final latents
        jax.ShapeDtypeStruct((B, H * N, LW), jnp.float32),  # energy (padded)
    )
    lat_out, energy_out = pl.pallas_call(
        kernel,
        out_shape=out_shape,
        grid_spec=pltpu.PrefetchScalarGridSpec(
            num_scalar_prefetch=0,
            grid=(B // bt,),                      # parallel batch grid (v7x 2 TCs)
            in_specs=[
                pl.BlockSpec((bt, S, LW), lambda b: (b, 0, 0)),
                # Weight slabs map to the same block every step -> resident.
                pl.BlockSpec((mm_slab.shape[0], LW), lambda b: (0, 0)),
                pl.BlockSpec((vec_slab.shape[0], LW), lambda b: (0, 0)),
            ],
            out_specs=[
                pl.BlockSpec((bt, N, LW), lambda b: (b, 0, 0)),
                pl.BlockSpec((bt, H * N, LW), lambda b: (b, 0, 0)),
            ],
        ),
        compiler_params=pltpu.CompilerParams(
            dimension_semantics=("parallel",),
            vmem_limit_bytes=32 * 1024 * 1024),
    )(x_p, mm_slab, vec_slab)

    # Tiny classification head + log_softmax in the XLA wrapper (review item).
    lat = lat_out[:, :, :D].reshape(B, N * D)
    logits = lat @ params["head_w"].astype(jnp.float32) + params["head_b"][0]
    log_probs = jax.nn.log_softmax(logits, axis=-1)
    energy = energy_out[:, :, :S].reshape(B, H, N, S)
    return log_probs, energy


# ----------------------- pure-JAX reference (for checks) ----------------------

def reference_forward(params, x, *, num_heads, num_latent_heads):
    B, S, C = x.shape
    emb = params["embeddings"]
    N, D = emb.shape[1], emb.shape[2]

    def layernorm(v, g, b, eps=1e-5):
        mu = v.mean(-1, keepdims=True)
        var = ((v - mu) ** 2).mean(-1, keepdims=True)
        return (v - mu) / jnp.sqrt(var + eps) * g + b

    def mha(q, k, v, nh):
        dm = q.shape[-1]
        dh = dm // nh
        qh = q.reshape(B, -1, nh, dh)
        kh = k.reshape(B, -1, nh, dh)
        vh = v.reshape(B, -1, nh, dh)
        s = jnp.einsum("bqhe,bkhe->bhqk", qh, kh) / jnp.sqrt(dh)
        p = jax.nn.softmax(s, axis=-1)
        o = jnp.einsum("bhqk,bkhe->bqhe", p, vh).reshape(B, -1, dm)
        return o, p

    lat = jnp.broadcast_to(emb, (B, N, D)).astype(jnp.float32)
    energy = None
    for per in params["perceivers"]:
        cp = per["cross"]
        hl = layernorm(lat, cp["ln_lat"][0], cp["ln_lat"][1])
        hc = layernorm(x, cp["ln_ctx"][0], cp["ln_ctx"][1])
        q = hl @ cp["w_q"] + cp["b_qo"][0]
        kv = hc @ cp["w_kv"] + cp["b_kv"][0]
        k, v = kv[..., :D], kv[..., D:]
        o, energy = mha(q, k, v, num_heads)
        lat = lat + o @ cp["w_o"] + cp["b_qo"][1]
        for tp in per["latent"]:
            h1 = layernorm(lat, tp["ln"][0], tp["ln"][1])
            qkv = h1 @ tp["w_qkv"] + tp["b_qkv"][0]
            q, k, v = qkv[..., :D], qkv[..., D:2 * D], qkv[..., 2 * D:]
            o, _ = mha(q, k, v, num_latent_heads)
            lat = lat + o @ tp["w_o"] + tp["b_o2"][0]
            h2 = layernorm(lat, tp["ln"][2], tp["ln"][3])
            m = jax.nn.relu(h2 @ tp["w_1"] + tp["b_1"][0])
            lat = lat + m @ tp["w_2"] + tp["b_o2"][1]
    logits = lat.reshape(B, -1) @ params["head_w"] + params["head_b"][0]
    return jax.nn.log_softmax(logits, axis=-1), energy


# ----------------------------------- main -------------------------------------

if __name__ == "__main__":
    # Small hyper-parameters consistent with the module's __init__.
    in_dim = 16
    embbed_dim = 32
    num_embbeds = 4
    num_classes = 5
    num_perceivers = 2
    num_latent_transformers = 1
    num_heads = 1
    num_latent_heads = 4

    batch = 2
    seq_len = 8

    key = jax.random.PRNGKey(0)
    k_x, k_p = jax.random.split(key)
    x = jax.random.normal(k_x, (batch, seq_len, in_dim), dtype=jnp.float32)
    params = init_params(
        k_p,
        in_dim=in_dim, embbed_dim=embbed_dim, num_embbeds=num_embbeds,
        num_classes=num_classes, num_perceivers=num_perceivers,
        num_latent_transformers=num_latent_transformers)

    fwd = jax.jit(functools.partial(
        constituentnet_perceiver_forward,
        num_heads=num_heads, num_latent_heads=num_latent_heads,
        mm_dtype=jnp.bfloat16, batch_tile=1))     # bf16 MXU path, parallel grid
    fwd_f32 = jax.jit(functools.partial(
        constituentnet_perceiver_forward,
        num_heads=num_heads, num_latent_heads=num_latent_heads,
        mm_dtype=jnp.float32, batch_tile=1))      # exact path, reference check

    log_probs, energy = fwd(params, x)
    jax.block_until_ready((log_probs, energy))

    assert log_probs.shape == (batch, num_classes)
    assert energy.shape == (batch, num_heads, num_embbeds, seq_len)
    # log_softmax rows should exp-sum to 1.
    assert bool(jnp.allclose(jnp.sum(jnp.exp(log_probs), axis=-1), 1.0, atol=1e-3))

    # Numerical check of the fused kernel (f32 matmul path) vs a pure-JAX ref.
    lp32, en32 = fwd_f32(params, x)
    ref_lp, ref_en = reference_forward(
        params, x, num_heads=num_heads, num_latent_heads=num_latent_heads)
    jax.block_until_ready((lp32, en32))
    assert bool(jnp.allclose(lp32, ref_lp, atol=5e-2)), "log_probs mismatch vs reference"
    assert bool(jnp.allclose(en32, ref_en, atol=5e-2)), "energy mismatch vs reference"

    print("KERNEL_OK")
</pallas_src>

<mosaic_0001>
module attributes {stable_mosaic.version = 11 : i64} {
  func.func @kernel(%arg0: i32, %arg1: memref<1x8x128xf32, #tpu.memory_space<vmem>>, %arg2: memref<1792x128xbf16, #tpu.memory_space<vmem>>, %arg3: memref<40x128xf32, #tpu.memory_space<vmem>>, %arg4: memref<1x4x128xf32, #tpu.memory_space<vmem>>, %arg5: memref<1x4x128xf32, #tpu.memory_space<vmem>>) attributes {dimension_semantics = [#tpu.dimension_semantics<parallel>], iteration_bounds = array<i64: 2>, scalar_prefetch = 0 : i64, scratch_operands = 0 : i64, tpu.core_type = #tpu.core_type<tc>, window_params = [{transform_indices = @transform_0, window_bounds = array<i64: 1, 8, 128>}, {pipeline_mode = #tpu.pipeline_mode<synchronous>, transform_indices = @transform_1, window_bounds = array<i64: 1792, 128>}, {pipeline_mode = #tpu.pipeline_mode<synchronous>, transform_indices = @transform_2, window_bounds = array<i64: 40, 128>}, {transform_indices = @transform_3, window_bounds = array<i64: 1, 4, 128>}, {transform_indices = @transform_4, window_bounds = array<i64: 1, 4, 128>}]} {
    %c0 = arith.constant 0 : index
    %c0_0 = arith.constant 0 : index
    %c0_1 = arith.constant 0 : index
    %0 = vector.load %arg1[%c0, %c0_0, %c0_1] : memref<1x8x128xf32, #tpu.memory_space<vmem>>, vector<1x8x128xf32>
    %1 = vector.shape_cast %0 : vector<1x8x128xf32> to vector<8x128xf32>
    %c0_2 = arith.constant 0 : index
    %c0_3 = arith.constant 0 : index
    %2 = vector.load %arg3[%c0_2, %c0_3] : memref<40x128xf32, #tpu.memory_space<vmem>>, vector<4x128xf32>
    %3 = vector.shape_cast %2 : vector<4x128xf32> to vector<1x4x128xf32>
    %4 = vector.shape_cast %3 : vector<1x4x128xf32> to vector<4x128xf32>
    %c4 = arith.constant 4 : index
    %c0_4 = arith.constant 0 : index
    %5 = vector.load %arg3[%c4, %c0_4] : memref<40x128xf32, #tpu.memory_space<vmem>>, vector<1x128xf32>
    %c5 = arith.constant 5 : index
    %c0_5 = arith.constant 0 : index
    %6 = vector.load %arg3[%c5, %c0_5] : memref<40x128xf32, #tpu.memory_space<vmem>>, vector<1x128xf32>
    %cst = arith.constant dense<0.000000e+00> : vector<4xf32>
    %7 = vector.multi_reduction <add>, %4, %cst [1] : vector<4x128xf32> to vector<4xf32>
    %8 = vector.shape_cast %7 : vector<4xf32> to vector<4x1xf32>
    %cst_6 = arith.constant 3.125000e-02 : f32
    %9 = vector.broadcast %cst_6 : f32 to vector<4x1xf32>
    %10 = arith.mulf %8, %9 : vector<4x1xf32>
    %11 = arith.mulf %4, %4 : vector<4x128xf32>
    %cst_7 = arith.constant dense<0.000000e+00> : vector<4xf32>
    %12 = vector.multi_reduction <add>, %11, %cst_7 [1] : vector<4x128xf32> to vector<4xf32>
    %13 = vector.shape_cast %12 : vector<4xf32> to vector<4x1xf32>
    %cst_8 = arith.constant 3.125000e-02 : f32
    %14 = vector.broadcast %cst_8 : f32 to vector<4x1xf32>
    %15 = arith.mulf %13, %14 : vector<4x1xf32>
    %16 = arith.mulf %10, %10 : vector<4x1xf32>
    %17 = arith.subf %15, %16 : vector<4x1xf32>
    %18 = vector.broadcast %10 : vector<4x1xf32> to vector<4x128xf32>
    %19 = arith.subf %4, %18 : vector<4x128xf32>
    %cst_9 = arith.constant 9.99999974E-6 : f32
    %20 = vector.broadcast %cst_9 : f32 to vector<4x1xf32>
    %21 = arith.addf %17, %20 : vector<4x1xf32>
    %22 = math.rsqrt %21 : vector<4x1xf32>
    %23 = vector.broadcast %22 : vector<4x1xf32> to vector<4x128xf32>
    %24 = arith.mulf %19, %23 : vector<4x128xf32>
    %25 = vector.broadcast %5 : vector<1x128xf32> to vector<4x128xf32>
    %26 = arith.mulf %24, %25 : vector<4x128xf32>
    %27 = vector.broadcast %6 : vector<1x128xf32> to vector<4x128xf32>
    %28 = arith.addf %26, %27 : vector<4x128xf32>
    %c6 = arith.constant 6 : index
    %c0_10 = arith.constant 0 : index
    %29 = vector.load %arg3[%c6, %c0_10] : memref<40x128xf32, #tpu.memory_space<vmem>>, vector<1x128xf32>
    %c7 = arith.constant 7 : index
    %c0_11 = arith.constant 0 : index
    %30 = vector.load %arg3[%c7, %c0_11] : memref<40x128xf32, #tpu.memory_space<vmem>>, vector<1x128xf32>
    %cst_12 = arith.constant dense<0.000000e+00> : vector<8xf32>
    %31 = vector.multi_reduction <add>, %1, %cst_12 [1] : vector<8x128xf32> to vector<8xf32>
    %32 = vector.shape_cast %31 : vector<8xf32> to vector<8x1xf32>
    %cst_13 = arith.constant 6.250000e-02 : f32
    %33 = vector.broadcast %cst_13 : f32 to vector<8x1xf32>
    %34 = arith.mulf %32, %33 : vector<8x1xf32>
    %35 = arith.mulf %1, %1 : vector<8x128xf32>
    %cst_14 = arith.constant dense<0.000000e+00> : vector<8xf32>
    %36 = vector.multi_reduction <add>, %35, %cst_14 [1] : vector<8x128xf32> to vector<8xf32>
    %37 = vector.shape_cast %36 : vector<8xf32> to vector<8x1xf32>
    %cst_15 = arith.constant 6.250000e-02 : f32
    %38 = vector.broadcast %cst_15 : f32 to vector<8x1xf32>
    %39 = arith.mulf %37, %38 : vector<8x1xf32>
    %40 = arith.mulf %34, %34 : vector<8x1xf32>
    %41 = arith.subf %39, %40 : vector<8x1xf32>
    %42 = vector.broadcast %34 : vector<8x1xf32> to vector<8x128xf32>
    %43 = arith.subf %1, %42 : vector<8x128xf32>
    %cst_16 = arith.constant 9.99999974E-6 : f32
    %44 = vector.broadcast %cst_16 : f32 to vector<8x1xf32>
    %45 = arith.addf %41, %44 : vector<8x1xf32>
    %46 = math.rsqrt %45 : vector<8x1xf32>
    %47 = vector.broadcast %46 : vector<8x1xf32> to vector<8x128xf32>
    %48 = arith.mulf %43, %47 : vector<8x128xf32>
    %49 = vector.broadcast %29 : vector<1x128xf32> to vector<8x128xf32>
    %50 = arith.mulf %48, %49 : vector<8x128xf32>
    %51 = vector.broadcast %30 : vector<1x128xf32> to vector<8x128xf32>
    %52 = arith.addf %50, %51 : vector<8x128xf32>
    %c0_17 = arith.constant 0 : index
    %c0_18 = arith.constant 0 : index
    %53 = vector.load %arg2[%c0_17, %c0_18] : memref<1792x128xbf16, #tpu.memory_space<vmem>>, vector<128x128xbf16>
    %54 = arith.truncf %28 : vector<4x128xf32> to vector<4x128xbf16>
    %cst_19 = arith.constant dense<0.000000e+00> : vector<4x128xf32>
    %55 = tpu.matmul %54, %53, %cst_19 {dimension_numbers = #tpu.dot_dimension_numbers<[1], [0], [0], [1], [0, 0, 1, 1], [], []>} : vector<4x128xbf16>, vector<128x128xbf16>, vector<4x128xf32> -> vector<4x128xf32>
    %c8 = arith.constant 8 : index
    %c0_20 = arith.constant 0 : index
    %56 = vector.load %arg3[%c8, %c0_20] : memref<40x128xf32, #tpu.memory_space<vmem>>, vector<1x128xf32>
    %57 = vector.broadcast %56 : vector<1x128xf32> to vector<4x128xf32>
    %58 = arith.addf %55, %57 : vector<4x128xf32>
    %c128 = arith.constant 128 : index
    %c0_21 = arith.constant 0 : index
    %59 = vector.load %arg2[%c128, %c0_21] : memref<1792x128xbf16, #tpu.memory_space<vmem>>, vector<128x128xbf16>
    %60 = arith.truncf %52 : vector<8x128xf32> to vector<8x128xbf16>
    %cst_22 = arith.constant dense<0.000000e+00> : vector<8x128xf32>
    %61 = tpu.matmul %60, %59, %cst_22 {dimension_numbers = #tpu.dot_dimension_numbers<[1], [0], [0], [1], [0, 0, 1, 1], [], []>} : vector<8x128xbf16>, vector<128x128xbf16>, vector<8x128xf32> -> vector<8x128xf32>
    %c10 = arith.constant 10 : index
    %c0_23 = arith.constant 0 : index
    %62 = vector.load %arg3[%c10, %c0_23] : memref<40x128xf32, #tpu.memory_space<vmem>>, vector<1x128xf32>
    %63 = vector.broadcast %62 : vector<1x128xf32> to vector<8x128xf32>
    %64 = arith.addf %61, %63 : vector<8x128xf32>
    %c256 = arith.constant 256 : index
    %c0_24 = arith.constant 0 : index
    %65 = vector.load %arg2[%c256, %c0_24] : memref<1792x128xbf16, #tpu.memory_space<vmem>>, vector<128x128xbf16>
    %66 = vector.extract_strided_slice %65 {offsets = [0, 0], sizes = [32, 128], strides = [1, 1]} : vector<128x128xbf16> to vector<32x128xbf16>
    %67 = vector.shape_cast %66 : vector<32x128xbf16> to vector<1x32x128xbf16>
    %68 = vector.extract_strided_slice %58 {offsets = [0, 0], sizes = [4, 32], strides = [1, 1]} : vector<4x128xf32> to vector<4x32xf32>
    %69 = vector.shape_cast %68 : vector<4x32xf32> to vector<1x4x32xf32>
    %70 = arith.truncf %69 : vector<1x4x32xf32> to vector<1x4x32xbf16>
    %71 = vector.extract_strided_slice %64 {offsets = [0, 0], sizes = [8, 32], strides = [1, 1]} : vector<8x128xf32> to vector<8x32xf32>
    %72 = vector.shape_cast %71 : vector<8x32xf32> to vector<1x8x32xf32>
    %73 = arith.truncf %72 : vector<1x8x32xf32> to vector<1x8x32xbf16>
    %74 = vector.extract_strided_slice %64 {offsets = [0, 32], sizes = [8, 32], strides = [1, 1]} : vector<8x128xf32> to vector<8x32xf32>
    %75 = vector.shape_cast %74 : vector<8x32xf32> to vector<1x8x32xf32>
    %76 = arith.truncf %75 : vector<1x8x32xf32> to vector<1x8x32xbf16>
    "tpu.trace_start"() <{level = 10 : i32, message = "gqe,gke->gqk"}> : () -> ()
    %cst_25 = arith.constant dense<0.000000e+00> : vector<1x4x8xf32>
    %77 = tpu.matmul %70, %73, %cst_25 {dimension_numbers = #tpu.dot_dimension_numbers<[2], [2], [1], [1], [0, 0, 0, 1, 1, 1], [0], [0]>} : vector<1x4x32xbf16>, vector<1x8x32xbf16>, vector<1x4x8xf32> -> vector<1x4x8xf32>
    "tpu.trace_stop"() : () -> ()
    %cst_26 = arith.constant 0.176776692 : f32
    %78 = vector.broadcast %cst_26 : f32 to vector<1x4x8xf32>
    %79 = arith.mulf %77, %78 : vector<1x4x8xf32>
    %cst_27 = arith.constant dense<0xFF800000> : vector<1x4xf32>
    %80 = vector.multi_reduction <maximumf>, %79, %cst_27 [2] : vector<1x4x8xf32> to vector<1x4xf32>
    %81 = vector.shape_cast %80 : vector<1x4xf32> to vector<1x4x1xf32>
    %82 = vector.broadcast %81 : vector<1x4x1xf32> to vector<1x4x8xf32>
    %83 = arith.subf %79, %82 : vector<1x4x8xf32>
    %84 = math.exp %83 : vector<1x4x8xf32>
    %cst_28 = arith.constant dense<0.000000e+00> : vector<1x4xf32>
    %85 = vector.multi_reduction <add>, %84, %cst_28 [2] : vector<1x4x8xf32> to vector<1x4xf32>
    %86 = vector.shape_cast %85 : vector<1x4xf32> to vector<1x4x1xf32>
    %87 = vector.broadcast %86 : vector<1x4x1xf32> to vector<1x4x8xf32>
    %88 = arith.divf %84, %87 : vector<1x4x8xf32>
    %89 = arith.truncf %88 : vector<1x4x8xf32> to vector<1x4x8xbf16>
    "tpu.trace_start"() <{level = 10 : i32, message = "gqk,gke->gqe"}> : () -> ()
    %cst_29 = arith.constant dense<0.000000e+00> : vector<1x4x32xf32>
    %90 = tpu.matmul %89, %76, %cst_29 {dimension_numbers = #tpu.dot_dimension_numbers<[2], [1], [1], [2], [0, 0, 0, 1, 1, 2], [0], [0]>} : vector<1x4x8xbf16>, vector<1x8x32xbf16>, vector<1x4x32xf32> -> vector<1x4x32xf32>
    "tpu.trace_stop"() : () -> ()
    %91 = arith.truncf %90 : vector<1x4x32xf32> to vector<1x4x32xbf16>
    "tpu.trace_start"() <{level = 10 : i32, message = "hme,heo->hmo"}> : () -> ()
    %cst_30 = arith.constant dense<0.000000e+00> : vector<1x4x128xf32>
    %92 = tpu.matmul %91, %67, %cst_30 {dimension_numbers = #tpu.dot_dimension_numbers<[2], [1], [1], [2], [0, 0, 0, 1, 1, 2], [0], [0]>} : vector<1x4x32xbf16>, vector<1x32x128xbf16>, vector<1x4x128xf32> -> vector<1x4x128xf32>
    "tpu.trace_stop"() : () -> ()
    %93 = vector.shape_cast %92 : vector<1x4x128xf32> to vector<4x128xf32>
    %94 = arith.addf %4, %93 : vector<4x128xf32>
    %c9 = arith.constant 9 : index
    %c0_31 = arith.constant 0 : index
    %95 = vector.load %arg3[%c9, %c0_31] : memref<40x128xf32, #tpu.memory_space<vmem>>, vector<1x128xf32>
    %96 = vector.broadcast %95 : vector<1x128xf32> to vector<4x128xf32>
    %97 = arith.addf %94, %96 : vector<4x128xf32>
    %c11 = arith.constant 11 : index
    %c0_32 = arith.constant 0 : index
    %98 = vector.load %arg3[%c11, %c0_32] : memref<40x128xf32, #tpu.memory_space<vmem>>, vector<1x128xf32>
    %c12 = arith.constant 12 : index
    %c0_33 = arith.constant 0 : index
    %99 = vector.load %arg3[%c12, %c0_33] : memref<40x128xf32, #tpu.memory_space<vmem>>, vector<1x128xf32>
    %cst_34 = arith.constant dense<0.000000e+00> : vector<4xf32>
    %100 = vector.multi_reduction <add>, %97, %cst_34 [1] : vector<4x128xf32> to vector<4xf32>
    %101 = vector.shape_cast %100 : vector<4xf32> to vector<4x1xf32>
    %cst_35 = arith.constant 3.125000e-02 : f32
    %102 = vector.broadcast %cst_35 : f32 to vector<4x1xf32>
    %103 = arith.mulf %101, %102 : vector<4x1xf32>
    %104 = arith.mulf %97, %97 : vector<4x128xf32>
    %cst_36 = arith.constant dense<0.000000e+00> : vector<4xf32>
    %105 = vector.multi_reduction <add>, %104, %cst_36 [1] : vector<4x128xf32> to vector<4xf32>
    %106 = vector.shape_cast %105 : vector<4xf32> to vector<4x1xf32>
    %cst_37 = arith.constant 3.125000e-02 : f32
    %107 = vector.broadcast %cst_37 : f32 to vector<4x1xf32>
    %108 = arith.mulf %106, %107 : vector<4x1xf32>
    %109 = arith.mulf %103, %103 : vector<4x1xf32>
    %110 = arith.subf %108, %109 : vector<4x1xf32>
    %111 = vector.broadcast %103 : vector<4x1xf32> to vector<4x128xf32>
    %112 = arith.subf %97, %111 : vector<4x128xf32>
    %cst_38 = arith.constant 9.99999974E-6 : f32
    %113 = vector.broadcast %cst_38 : f32 to vector<4x1xf32>
    %114 = arith.addf %110, %113 : vector<4x1xf32>
    %115 = math.rsqrt %114 : vector<4x1xf32>
    %116 = vector.broadcast %115 : vector<4x1xf32> to vector<4x128xf32>
    %117 = arith.mulf %112, %116 : vector<4x128xf32>
    %118 = vector.broadcast %98 : vector<1x128xf32> to vector<4x128xf32>
    %119 = arith.mulf %117, %118 : vector<4x128xf32>
    %120 = vector.broadcast %99 : vector<1x128xf32> to vector<4x128xf32>
    %121 = arith.addf %119, %120 : vector<4x128xf32>
    %c384 = arith.constant 384 : index
    %c0_39 = arith.constant 0 : index
    %122 = vector.load %arg2[%c384, %c0_39] : memref<1792x128xbf16, #tpu.memory_space<vmem>>, vector<128x128xbf16>
    %123 = arith.truncf %121 : vector<4x128xf32> to vector<4x128xbf16>
    %cst_40 = arith.constant dense<0.000000e+00> : vector<4x128xf32>
    %124 = tpu.matmul %123, %122, %cst_40 {dimension_numbers = #tpu.dot_dimension_numbers<[1], [0], [0], [1], [0, 0, 1, 1], [], []>} : vector<4x128xbf16>, vector<128x128xbf16>, vector<4x128xf32> -> vector<4x128xf32>
    %c15 = arith.constant 15 : index
    %c0_41 = arith.constant 0 : index
    %125 = vector.load %arg3[%c15, %c0_41] : memref<40x128xf32, #tpu.memory_space<vmem>>, vector<1x128xf32>
    %126 = vector.broadcast %125 : vector<1x128xf32> to vector<4x128xf32>
    %127 = arith.addf %124, %126 : vector<4x128xf32>
    %c512 = arith.constant 512 : index
    %c0_42 = arith.constant 0 : index
    %128 = vector.load %arg2[%c512, %c0_42] : memref<1792x128xbf16, #tpu.memory_space<vmem>>, vector<128x128xbf16>
    %129 = vector.extract_strided_slice %128 {offsets = [0, 0], sizes = [32, 128], strides = [1, 1]} : vector<128x128xbf16> to vector<32x128xbf16>
    %130 = vector.shape_cast %129 : vector<32x128xbf16> to vector<4x8x128xbf16>
    %131 = vector.extract_strided_slice %127 {offsets = [0, 0], sizes = [4, 8], strides = [1, 1]} : vector<4x128xf32> to vector<4x8xf32>
    %132 = vector.shape_cast %131 : vector<4x8xf32> to vector<1x4x8xf32>
    %133 = vector.extract_strided_slice %127 {offsets = [0, 8], sizes = [4, 8], strides = [1, 1]} : vector<4x128xf32> to vector<4x8xf32>
    %134 = vector.shape_cast %133 : vector<4x8xf32> to vector<1x4x8xf32>
    %135 = vector.extract_strided_slice %127 {offsets = [0, 16], sizes = [4, 8], strides = [1, 1]} : vector<4x128xf32> to vector<4x8xf32>
    %136 = vector.shape_cast %135 : vector<4x8xf32> to vector<1x4x8xf32>
    %137 = vector.extract_strided_slice %127 {offsets = [0, 24], sizes = [4, 8], strides = [1, 1]} : vector<4x128xf32> to vector<4x8xf32>
    %138 = vector.shape_cast %137 : vector<4x8xf32> to vector<1x4x8xf32>
    %139 = tpu.concatenate %132, %134, %136, %138 in 0 : vector<1x4x8xf32>, vector<1x4x8xf32>, vector<1x4x8xf32>, vector<1x4x8xf32> -> vector<4x4x8xf32>
    %140 = arith.truncf %139 : vector<4x4x8xf32> to vector<4x4x8xbf16>
    %141 = vector.extract_strided_slice %127 {offsets = [0, 32], sizes = [4, 8], strides = [1, 1]} : vector<4x128xf32> to vector<4x8xf32>
    %142 = vector.shape_cast %141 : vector<4x8xf32> to vector<1x4x8xf32>
    %143 = vector.extract_strided_slice %127 {offsets = [0, 40], sizes = [4, 8], strides = [1, 1]} : vector<4x128xf32> to vector<4x8xf32>
    %144 = vector.shape_cast %143 : vector<4x8xf32> to vector<1x4x8xf32>
    %145 = vector.extract_strided_slice %127 {offsets = [0, 48], sizes = [4, 8], strides = [1, 1]} : vector<4x128xf32> to vector<4x8xf32>
    %146 = vector.shape_cast %145 : vector<4x8xf32> to vector<1x4x8xf32>
    %147 = vector.extract_strided_slice %127 {offsets = [0, 56], sizes = [4, 8], strides = [1, 1]} : vector<4x128xf32> to vector<4x8xf32>
    %148 = vector.shape_cast %147 : vector<4x8xf32> to vector<1x4x8xf32>
    %149 = tpu.concatenate %142, %144, %146, %148 in 0 : vector<1x4x8xf32>, vector<1x4x8xf32>, vector<1x4x8xf32>, vector<1x4x8xf32> -> vector<4x4x8xf32>
    %150 = arith.truncf %149 : vector<4x4x8xf32> to vector<4x4x8xbf16>
    %151 = vector.extract_strided_slice %127 {offsets = [0, 64], sizes = [4, 8], strides = [1, 1]} : vector<4x128xf32> to vector<4x8xf32>
    %152 = vector.shape_cast %151 : vector<4x8xf32> to vector<1x4x8xf32>
    %153 = vector.extract_strided_slice %127 {offsets = [0, 72], sizes = [4, 8], strides = [1, 1]} : vector<4x128xf32> to vector<4x8xf32>
    %154 = vector.shape_cast %153 : vector<4x8xf32> to vector<1x4x8xf32>
    %155 = vector.extract_strided_slice %127 {offsets = [0, 80], sizes = [4, 8], strides = [1, 1]} : vector<4x128xf32> to vector<4x8xf32>
    %156 = vector.shape_cast %155 : vector<4x8xf32> to vector<1x4x8xf32>
    %157 = vector.extract_strided_slice %127 {offsets = [0, 88], sizes = [4, 8], strides = [1, 1]} : vector<4x128xf32> to vector<4x8xf32>
    %158 = vector.shape_cast %157 : vector<4x8xf32> to vector<1x4x8xf32>
    %159 = tpu.concatenate %152, %154, %156, %158 in 0 : vector<1x4x8xf32>, vector<1x4x8xf32>, vector<1x4x8xf32>, vector<1x4x8xf32> -> vector<4x4x8xf32>
    %160 = arith.truncf %159 : vector<4x4x8xf32> to vector<4x4x8xbf16>
    "tpu.trace_start"() <{level = 10 : i32, message = "gqe,gke->gqk"}> : () -> ()
    %cst_43 = arith.constant dense<0.000000e+00> : vector<4x4x4xf32>
    %161 = tpu.matmul %140, %150, %cst_43 {dimension_numbers = #tpu.dot_dimension_numbers<[2], [2], [1], [1], [0, 0, 0, 1, 1, 1], [0], [0]>} : vector<4x4x8xbf16>, vector<4x4x8xbf16>, vector<4x4x4xf32> -> vector<4x4x4xf32>
    "tpu.trace_stop"() : () -> ()
    %cst_44 = arith.constant 0.353553385 : f32
    %162 = vector.broadcast %cst_44 : f32 to vector<4x4x4xf32>
    %163 = arith.mulf %161, %162 : vector<4x4x4xf32>
    %cst_45 = arith.constant dense<0xFF800000> : vector<4x4xf32>
    %164 = vector.multi_reduction <maximumf>, %163, %cst_45 [2] : vector<4x4x4xf32> to vector<4x4xf32>
    %165 = vector.shape_cast %164 : vector<4x4xf32> to vector<4x4x1xf32>
    %166 = vector.broadcast %165 : vector<4x4x1xf32> to vector<4x4x4xf32>
    %167 = arith.subf %163, %166 : vector<4x4x4xf32>
    %168 = math.exp %167 : vector<4x4x4xf32>
    %cst_46 = arith.constant dense<0.000000e+00> : vector<4x4xf32>
    %169 = vector.multi_reduction <add>, %168, %cst_46 [2] : vector<4x4x4xf32> to vector<4x4xf32>
    %170 = vector.shape_cast %169 : vector<4x4xf32> to vector<4x4x1xf32>
    %171 = tpu.reciprocal %170 {approx = true} : vector<4x4x1xf32> -> vector<4x4x1xf32>
    %172 = vector.broadcast %171 : vector<4x4x1xf32> to vector<4x4x4xf32>
    %173 = arith.mulf %168, %172 : vector<4x4x4xf32>
    %174 = arith.truncf %173 : vector<4x4x4xf32> to vector<4x4x4xbf16>
    "tpu.trace_start"() <{level = 10 : i32, message = "gqk,gke->gqe"}> : () -> ()
    %cst_47 = arith.constant dense<0.000000e+00> : vector<4x4x8xf32>
    %175 = tpu.matmul %174, %160, %cst_47 {dimension_numbers = #tpu.dot_dimension_numbers<[2], [1], [1], [2], [0, 0, 0, 1, 1, 2], [0], [0]>} : vector<4x4x4xbf16>, vector<4x4x8xbf16>, vector<4x4x8xf32> -> vector<4x4x8xf32>
    "tpu.trace_stop"() : () -> ()
    %176 = arith.truncf %175 : vector<4x4x8xf32> to vector<4x4x8xbf16>
    "tpu.trace_start"() <{level = 10 : i32, message = "hme,heo->hmo"}> : () -> ()
    %cst_48 = arith.constant dense<0.000000e+00> : vector<4x4x128xf32>
    %177 = tpu.matmul %176, %130, %cst_48 {dimension_numbers = #tpu.dot_dimension_numbers<[2], [1], [1], [2], [0, 0, 0, 1, 1, 2], [0], [0]>} : vector<4x4x8xbf16>, vector<4x8x128xbf16>, vector<4x4x128xf32> -> vector<4x4x128xf32>
    "tpu.trace_stop"() : () -> ()
    %178 = vector.extract_strided_slice %177 {offsets = [0, 0, 0], sizes = [1, 4, 128], strides = [1, 1, 1]} : vector<4x4x128xf32> to vector<1x4x128xf32>
    %179 = vector.shape_cast %178 : vector<1x4x128xf32> to vector<4x128xf32>
    %180 = vector.extract_strided_slice %177 {offsets = [1, 0, 0], sizes = [1, 4, 128], strides = [1, 1, 1]} : vector<4x4x128xf32> to vector<1x4x128xf32>
    %181 = vector.shape_cast %180 : vector<1x4x128xf32> to vector<4x128xf32>
    %182 = arith.addf %179, %181 : vector<4x128xf32>
    %183 = vector.extract_strided_slice %177 {offsets = [2, 0, 0], sizes = [1, 4, 128], strides = [1, 1, 1]} : vector<4x4x128xf32> to vector<1x4x128xf32>
    %184 = vector.shape_cast %183 : vector<1x4x128xf32> to vector<4x128xf32>
    %185 = arith.addf %182, %184 : vector<4x128xf32>
    %186 = vector.extract_strided_slice %177 {offsets = [3, 0, 0], sizes = [1, 4, 128], strides = [1, 1, 1]} : vector<4x4x128xf32> to vector<1x4x128xf32>
    %187 = vector.shape_cast %186 : vector<1x4x128xf32> to vector<4x128xf32>
    %188 = arith.addf %185, %187 : vector<4x128xf32>
    %189 = arith.addf %97, %188 : vector<4x128xf32>
    %c16 = arith.constant 16 : index
    %c0_49 = arith.constant 0 : index
    %190 = vector.load %arg3[%c16, %c0_49] : memref<40x128xf32, #tpu.memory_space<vmem>>, vector<1x128xf32>
    %191 = vector.broadcast %190 : vector<1x128xf32> to vector<4x128xf32>
    %192 = arith.addf %189, %191 : vector<4x128xf32>
    %c13 = arith.constant 13 : index
    %c0_50 = arith.constant 0 : index
    %193 = vector.load %arg3[%c13, %c0_50] : memref<40x128xf32, #tpu.memory_space<vmem>>, vector<1x128xf32>
    %c14 = arith.constant 14 : index
    %c0_51 = arith.constant 0 : index
    %194 = vector.load %arg3[%c14, %c0_51] : memref<40x128xf32, #tpu.memory_space<vmem>>, vector<1x128xf32>
    %cst_52 = arith.constant dense<0.000000e+00> : vector<4xf32>
    %195 = vector.multi_reduction <add>, %192, %cst_52 [1] : vector<4x128xf32> to vector<4xf32>
    %196 = vector.shape_cast %195 : vector<4xf32> to vector<4x1xf32>
    %cst_53 = arith.constant 3.125000e-02 : f32
    %197 = vector.broadcast %cst_53 : f32 to vector<4x1xf32>
    %198 = arith.mulf %196, %197 : vector<4x1xf32>
    %199 = arith.mulf %192, %192 : vector<4x128xf32>
    %cst_54 = arith.constant dense<0.000000e+00> : vector<4xf32>
    %200 = vector.multi_reduction <add>, %199, %cst_54 [1] : vector<4x128xf32> to vector<4xf32>
    %201 = vector.shape_cast %200 : vector<4xf32> to vector<4x1xf32>
    %cst_55 = arith.constant 3.125000e-02 : f32
    %202 = vector.broadcast %cst_55 : f32 to vector<4x1xf32>
    %203 = arith.mulf %201, %202 : vector<4x1xf32>
    %204 = arith.mulf %198, %198 : vector<4x1xf32>
    %205 = arith.subf %203, %204 : vector<4x1xf32>
    %206 = vector.broadcast %198 : vector<4x1xf32> to vector<4x128xf32>
    %207 = arith.subf %192, %206 : vector<4x128xf32>
    %cst_56 = arith.constant 9.99999974E-6 : f32
    %208 = vector.broadcast %cst_56 : f32 to vector<4x1xf32>
    %209 = arith.addf %205, %208 : vector<4x1xf32>
    %210 = math.rsqrt %209 : vector<4x1xf32>
    %211 = vector.broadcast %210 : vector<4x1xf32> to vector<4x128xf32>
    %212 = arith.mulf %207, %211 : vector<4x128xf32>
    %213 = vector.broadcast %193 : vector<1x128xf32> to vector<4x128xf32>
    %214 = arith.mulf %212, %213 : vector<4x128xf32>
    %215 = vector.broadcast %194 : vector<1x128xf32> to vector<4x128xf32>
    %216 = arith.addf %214, %215 : vector<4x128xf32>
    %c640 = arith.constant 640 : index
    %c0_57 = arith.constant 0 : index
    %217 = vector.load %arg2[%c640, %c0_57] : memref<1792x128xbf16, #tpu.memory_space<vmem>>, vector<128x128xbf16>
    %218 = arith.truncf %216 : vector<4x128xf32> to vector<4x128xbf16>
    %cst_58 = arith.constant dense<0.000000e+00> : vector<4x128xf32>
    %219 = tpu.matmul %218, %217, %cst_58 {dimension_numbers = #tpu.dot_dimension_numbers<[1], [0], [0], [1], [0, 0, 1, 1], [], []>} : vector<4x128xbf16>, vector<128x128xbf16>, vector<4x128xf32> -> vector<4x128xf32>
    %c18 = arith.constant 18 : index
    %c0_59 = arith.constant 0 : index
    %220 = vector.load %arg3[%c18, %c0_59] : memref<40x128xf32, #tpu.memory_space<vmem>>, vector<1x128xf32>
    %221 = vector.broadcast %220 : vector<1x128xf32> to vector<4x128xf32>
    %222 = arith.addf %219, %221 : vector<4x128xf32>
    %cst_60 = arith.constant 0.000000e+00 : f32
    %223 = vector.broadcast %cst_60 : f32 to vector<4x128xf32>
    %224 = arith.maximumf %222, %223 : vector<4x128xf32>
    %c768 = arith.constant 768 : index
    %c0_61 = arith.constant 0 : index
    %225 = vector.load %arg2[%c768, %c0_61] : memref<1792x128xbf16, #tpu.memory_space<vmem>>, vector<128x128xbf16>
    %226 = arith.truncf %224 : vector<4x128xf32> to vector<4x128xbf16>
    %cst_62 = arith.constant dense<0.000000e+00> : vector<4x128xf32>
    %227 = tpu.matmul %226, %225, %cst_62 {dimension_numbers = #tpu.dot_dimension_numbers<[1], [0], [0], [1], [0, 0, 1, 1], [], []>} : vector<4x128xbf16>, vector<128x128xbf16>, vector<4x128xf32> -> vector<4x128xf32>
    %228 = arith.addf %192, %227 : vector<4x128xf32>
    %c17 = arith.constant 17 : index
    %c0_63 = arith.constant 0 : index
    %229 = vector.load %arg3[%c17, %c0_63] : memref<40x128xf32, #tpu.memory_space<vmem>>, vector<1x128xf32>
    %230 = vector.broadcast %229 : vector<1x128xf32> to vector<4x128xf32>
    %231 = arith.addf %228, %230 : vector<4x128xf32>
    %c19 = arith.constant 19 : index
    %c0_64 = arith.constant 0 : index
    %232 = vector.load %arg3[%c19, %c0_64] : memref<40x128xf32, #tpu.memory_space<vmem>>, vector<1x128xf32>
    %c20 = arith.constant 20 : index
    %c0_65 = arith.constant 0 : index
    %233 = vector.load %arg3[%c20, %c0_65] : memref<40x128xf32, #tpu.memory_space<vmem>>, vector<1x128xf32>
    %cst_66 = arith.constant dense<0.000000e+00> : vector<4xf32>
    %234 = vector.multi_reduction <add>, %231, %cst_66 [1] : vector<4x128xf32> to vector<4xf32>
    %235 = vector.shape_cast %234 : vector<4xf32> to vector<4x1xf32>
    %cst_67 = arith.constant 3.125000e-02 : f32
    %236 = vector.broadcast %cst_67 : f32 to vector<4x1xf32>
    %237 = arith.mulf %235, %236 : vector<4x1xf32>
    %238 = arith.mulf %231, %231 : vector<4x128xf32>
    %cst_68 = arith.constant dense<0.000000e+00> : vector<4xf32>
    %239 = vector.multi_reduction <add>, %238, %cst_68 [1] : vector<4x128xf32> to vector<4xf32>
    %240 = vector.shape_cast %239 : vector<4xf32> to vector<4x1xf32>
    %cst_69 = arith.constant 3.125000e-02 : f32
    %241 = vector.broadcast %cst_69 : f32 to vector<4x1xf32>
    %242 = arith.mulf %240, %241 : vector<4x1xf32>
    %243 = arith.mulf %237, %237 : vector<4x1xf32>
    %244 = arith.subf %242, %243 : vector<4x1xf32>
    %245 = vector.broadcast %237 : vector<4x1xf32> to vector<4x128xf32>
    %246 = arith.subf %231, %245 : vector<4x128xf32>
    %cst_70 = arith.constant 9.99999974E-6 : f32
    %247 = vector.broadcast %cst_70 : f32 to vector<4x1xf32>
    %248 = arith.addf %244, %247 : vector<4x1xf32>
    %249 = math.rsqrt %248 : vector<4x1xf32>
    %250 = vector.broadcast %249 : vector<4x1xf32> to vector<4x128xf32>
    %251 = arith.mulf %246, %250 : vector<4x128xf32>
    %252 = vector.broadcast %232 : vector<1x128xf32> to vector<4x128xf32>
    %253 = arith.mulf %251, %252 : vector<4x128xf32>
    %254 = vector.broadcast %233 : vector<1x128xf32> to vector<4x128xf32>
    %255 = arith.addf %253, %254 : vector<4x128xf32>
    %c21 = arith.constant 21 : index
    %c0_71 = arith.constant 0 : index
    %256 = vector.load %arg3[%c21, %c0_71] : memref<40x128xf32, #tpu.memory_space<vmem>>, vector<1x128xf32>
    %c22 = arith.constant 22 : index
    %c0_72 = arith.constant 0 : index
    %257 = vector.load %arg3[%c22, %c0_72] : memref<40x128xf32, #tpu.memory_space<vmem>>, vector<1x128xf32>
    %cst_73 = arith.constant dense<0.000000e+00> : vector<8xf32>
    %258 = vector.multi_reduction <add>, %1, %cst_73 [1] : vector<8x128xf32> to vector<8xf32>
    %259 = vector.shape_cast %258 : vector<8xf32> to vector<8x1xf32>
    %cst_74 = arith.constant 6.250000e-02 : f32
    %260 = vector.broadcast %cst_74 : f32 to vector<8x1xf32>
    %261 = arith.mulf %259, %260 : vector<8x1xf32>
    %262 = arith.mulf %1, %1 : vector<8x128xf32>
    %cst_75 = arith.constant dense<0.000000e+00> : vector<8xf32>
    %263 = vector.multi_reduction <add>, %262, %cst_75 [1] : vector<8x128xf32> to vector<8xf32>
    %264 = vector.shape_cast %263 : vector<8xf32> to vector<8x1xf32>
    %cst_76 = arith.constant 6.250000e-02 : f32
    %265 = vector.broadcast %cst_76 : f32 to vector<8x1xf32>
    %266 = arith.mulf %264, %265 : vector<8x1xf32>
    %267 = arith.mulf %261, %261 : vector<8x1xf32>
    %268 = arith.subf %266, %267 : vector<8x1xf32>
    %269 = vector.broadcast %261 : vector<8x1xf32> to vector<8x128xf32>
    %270 = arith.subf %1, %269 : vector<8x128xf32>
    %cst_77 = arith.constant 9.99999974E-6 : f32
    %271 = vector.broadcast %cst_77 : f32 to vector<8x1xf32>
    %272 = arith.addf %268, %271 : vector<8x1xf32>
    %273 = math.rsqrt %272 : vector<8x1xf32>
    %274 = vector.broadcast %273 : vector<8x1xf32> to vector<8x128xf32>
    %275 = arith.mulf %270, %274 : vector<8x128xf32>
    %276 = vector.broadcast %256 : vector<1x128xf32> to vector<8x128xf32>
    %277 = arith.mulf %275, %276 : vector<8x128xf32>
    %278 = vector.broadcast %257 : vector<1x128xf32> to vector<8x128xf32>
    %279 = arith.addf %277, %278 : vector<8x128xf32>
    %c896 = arith.constant 896 : index
    %c0_78 = arith.constant 0 : index
    %280 = vector.load %arg2[%c896, %c0_78] : memref<1792x128xbf16, #tpu.memory_space<vmem>>, vector<128x128xbf16>
    %281 = arith.truncf %255 : vector<4x128xf32> to vector<4x128xbf16>
    %cst_79 = arith.constant dense<0.000000e+00> : vector<4x128xf32>
    %282 = tpu.matmul %281, %280, %cst_79 {dimension_numbers = #tpu.dot_dimension_numbers<[1], [0], [0], [1], [0, 0, 1, 1], [], []>} : vector<4x128xbf16>, vector<128x128xbf16>, vector<4x128xf32> -> vector<4x128xf32>
    %c23 = arith.constant 23 : index
    %c0_80 = arith.constant 0 : index
    %283 = vector.load %arg3[%c23, %c0_80] : memref<40x128xf32, #tpu.memory_space<vmem>>, vector<1x128xf32>
    %284 = vector.broadcast %283 : vector<1x128xf32> to vector<4x128xf32>
    %285 = arith.addf %282, %284 : vector<4x128xf32>
    %c1024 = arith.constant 1024 : index
    %c0_81 = arith.constant 0 : index
    %286 = vector.load %arg2[%c1024, %c0_81] : memref<1792x128xbf16, #tpu.memory_space<vmem>>, vector<128x128xbf16>
    %287 = arith.truncf %279 : vector<8x128xf32> to vector<8x128xbf16>
    %cst_82 = arith.constant dense<0.000000e+00> : vector<8x128xf32>
    %288 = tpu.matmul %287, %286, %cst_82 {dimension_numbers = #tpu.dot_dimension_numbers<[1], [0], [0], [1], [0, 0, 1, 1], [], []>} : vector<8x128xbf16>, vector<128x128xbf16>, vector<8x128xf32> -> vector<8x128xf32>
    %c25 = arith.constant 25 : index
    %c0_83 = arith.constant 0 : index
    %289 = vector.load %arg3[%c25, %c0_83] : memref<40x128xf32, #tpu.memory_space<vmem>>, vector<1x128xf32>
    %290 = vector.broadcast %289 : vector<1x128xf32> to vector<8x128xf32>
    %291 = arith.addf %288, %290 : vector<8x128xf32>
    %c1152 = arith.constant 1152 : index
    %c0_84 = arith.constant 0 : index
    %292 = vector.load %arg2[%c1152, %c0_84] : memref<1792x128xbf16, #tpu.memory_space<vmem>>, vector<128x128xbf16>
    %293 = vector.extract_strided_slice %292 {offsets = [0, 0], sizes = [32, 128], strides = [1, 1]} : vector<128x128xbf16> to vector<32x128xbf16>
    %294 = vector.shape_cast %293 : vector<32x128xbf16> to vector<1x32x128xbf16>
    %295 = vector.extract_strided_slice %285 {offsets = [0, 0], sizes = [4, 32], strides = [1, 1]} : vector<4x128xf32> to vector<4x32xf32>
    %296 = vector.shape_cast %295 : vector<4x32xf32> to vector<1x4x32xf32>
    %297 = arith.truncf %296 : vector<1x4x32xf32> to vector<1x4x32xbf16>
    %298 = vector.extract_strided_slice %291 {offsets = [0, 0], sizes = [8, 32], strides = [1, 1]} : vector<8x128xf32> to vector<8x32xf32>
    %299 = vector.shape_cast %298 : vector<8x32xf32> to vector<1x8x32xf32>
    %300 = arith.truncf %299 : vector<1x8x32xf32> to vector<1x8x32xbf16>
    %301 = vector.extract_strided_slice %291 {offsets = [0, 32], sizes = [8, 32], strides = [1, 1]} : vector<8x128xf32> to vector<8x32xf32>
    %302 = vector.shape_cast %301 : vector<8x32xf32> to vector<1x8x32xf32>
    %303 = arith.truncf %302 : vector<1x8x32xf32> to vector<1x8x32xbf16>
    "tpu.trace_start"() <{level = 10 : i32, message = "gqe,gke->gqk"}> : () -> ()
    %cst_85 = arith.constant dense<0.000000e+00> : vector<1x4x8xf32>
    %304 = tpu.matmul %297, %300, %cst_85 {dimension_numbers = #tpu.dot_dimension_numbers<[2], [2], [1], [1], [0, 0, 0, 1, 1, 1], [0], [0]>} : vector<1x4x32xbf16>, vector<1x8x32xbf16>, vector<1x4x8xf32> -> vector<1x4x8xf32>
    "tpu.trace_stop"() : () -> ()
    %cst_86 = arith.constant 0.176776692 : f32
    %305 = vector.broadcast %cst_86 : f32 to vector<1x4x8xf32>
    %306 = arith.mulf %304, %305 : vector<1x4x8xf32>
    %cst_87 = arith.constant dense<0xFF800000> : vector<1x4xf32>
    %307 = vector.multi_reduction <maximumf>, %306, %cst_87 [2] : vector<1x4x8xf32> to vector<1x4xf32>
    %308 = vector.shape_cast %307 : vector<1x4xf32> to vector<1x4x1xf32>
    %309 = vector.broadcast %308 : vector<1x4x1xf32> to vector<1x4x8xf32>
    %310 = arith.subf %306, %309 : vector<1x4x8xf32>
    %311 = math.exp %310 : vector<1x4x8xf32>
    %cst_88 = arith.constant dense<0.000000e+00> : vector<1x4xf32>
    %312 = vector.multi_reduction <add>, %311, %cst_88 [2] : vector<1x4x8xf32> to vector<1x4xf32>
    %313 = vector.shape_cast %312 : vector<1x4xf32> to vector<1x4x1xf32>
    %314 = vector.broadcast %313 : vector<1x4x1xf32> to vector<1x4x8xf32>
    %315 = arith.divf %311, %314 : vector<1x4x8xf32>
    %316 = arith.truncf %315 : vector<1x4x8xf32> to vector<1x4x8xbf16>
    "tpu.trace_start"() <{level = 10 : i32, message = "gqk,gke->gqe"}> : () -> ()
    %cst_89 = arith.constant dense<0.000000e+00> : vector<1x4x32xf32>
    %317 = tpu.matmul %316, %303, %cst_89 {dimension_numbers = #tpu.dot_dimension_numbers<[2], [1], [1], [2], [0, 0, 0, 1, 1, 2], [0], [0]>} : vector<1x4x8xbf16>, vector<1x8x32xbf16>, vector<1x4x32xf32> -> vector<1x4x32xf32>
    "tpu.trace_stop"() : () -> ()
    %318 = arith.truncf %317 : vector<1x4x32xf32> to vector<1x4x32xbf16>
    "tpu.trace_start"() <{level = 10 : i32, message = "hme,heo->hmo"}> : () -> ()
    %cst_90 = arith.constant dense<0.000000e+00> : vector<1x4x128xf32>
    %319 = tpu.matmul %318, %294, %cst_90 {dimension_numbers = #tpu.dot_dimension_numbers<[2], [1], [1], [2], [0, 0, 0, 1, 1, 2], [0], [0]>} : vector<1x4x32xbf16>, vector<1x32x128xbf16>, vector<1x4x128xf32> -> vector<1x4x128xf32>
    "tpu.trace_stop"() : () -> ()
    %320 = vector.shape_cast %319 : vector<1x4x128xf32> to vector<4x128xf32>
    %321 = arith.addf %231, %320 : vector<4x128xf32>
    %c24 = arith.constant 24 : index
    %c0_91 = arith.constant 0 : index
    %322 = vector.load %arg3[%c24, %c0_91] : memref<40x128xf32, #tpu.memory_space<vmem>>, vector<1x128xf32>
    %323 = vector.broadcast %322 : vector<1x128xf32> to vector<4x128xf32>
    %324 = arith.addf %321, %323 : vector<4x128xf32>
    %cst_92 = arith.constant 0.000000e+00 : f32
    %325 = vector.broadcast %cst_92 : f32 to vector<1x4x120xf32>
    %326 = tpu.concatenate %315, %325 in 2 : vector<1x4x8xf32>, vector<1x4x120xf32> -> vector<1x4x128xf32>
    %c0_93 = arith.constant 0 : index
    %c0_94 = arith.constant 0 : index
    %c0_95 = arith.constant 0 : index
    %327 = vector.load %arg5[%c0_93, %c0_94, %c0_95] : memref<1x4x128xf32, #tpu.memory_space<vmem>>, vector<1x4x128xf32>
    tpu.vector_store %arg5[%c0_93, %c0_94, %c0_95], %326 {strides = array<i32>} : memref<1x4x128xf32, #tpu.memory_space<vmem>>, vector<1x4x128xf32>,
    %c26 = arith.constant 26 : index
    %c0_96 = arith.constant 0 : index
    %328 = vector.load %arg3[%c26, %c0_96] : memref<40x128xf32, #tpu.memory_space<vmem>>, vector<1x128xf32>
    %c27 = arith.constant 27 : index
    %c0_97 = arith.constant 0 : index
    %329 = vector.load %arg3[%c27, %c0_97] : memref<40x128xf32, #tpu.memory_space<vmem>>, vector<1x128xf32>
    %cst_98 = arith.constant dense<0.000000e+00> : vector<4xf32>
    %330 = vector.multi_reduction <add>, %324, %cst_98 [1] : vector<4x128xf32> to vector<4xf32>
    %331 = vector.shape_cast %330 : vector<4xf32> to vector<4x1xf32>
    %cst_99 = arith.constant 3.125000e-02 : f32
    %332 = vector.broadcast %cst_99 : f32 to vector<4x1xf32>
    %333 = arith.mulf %331, %332 : vector<4x1xf32>
    %334 = arith.mulf %324, %324 : vector<4x128xf32>
    %cst_100 = arith.constant dense<0.000000e+00> : vector<4xf32>
    %335 = vector.multi_reduction <add>, %334, %cst_100 [1] : vector<4x128xf32> to vector<4xf32>
    %336 = vector.shape_cast %335 : vector<4xf32> to vector<4x1xf32>
    %cst_101 = arith.constant 3.125000e-02 : f32
    %337 = vector.broadcast %cst_101 : f32 to vector<4x1xf32>
    %338 = arith.mulf %336, %337 : vector<4x1xf32>
    %339 = arith.mulf %333, %333 : vector<4x1xf32>
    %340 = arith.subf %338, %339 : vector<4x1xf32>
    %341 = vector.broadcast %333 : vector<4x1xf32> to vector<4x128xf32>
    %342 = arith.subf %324, %341 : vector<4x128xf32>
    %cst_102 = arith.constant 9.99999974E-6 : f32
    %343 = vector.broadcast %cst_102 : f32 to vector<4x1xf32>
    %344 = arith.addf %340, %343 : vector<4x1xf32>
    %345 = math.rsqrt %344 : vector<4x1xf32>
    %346 = vector.broadcast %345 : vector<4x1xf32> to vector<4x128xf32>
    %347 = arith.mulf %342, %346 : vector<4x128xf32>
    %348 = vector.broadcast %328 : vector<1x128xf32> to vector<4x128xf32>
    %349 = arith.mulf %347, %348 : vector<4x128xf32>
    %350 = vector.broadcast %329 : vector<1x128xf32> to vector<4x128xf32>
    %351 = arith.addf %349, %350 : vector<4x128xf32>
    %c1280 = arith.constant 1280 : index
    %c0_103 = arith.constant 0 : index
    %352 = vector.load %arg2[%c1280, %c0_103] : memref<1792x128xbf16, #tpu.memory_space<vmem>>, vector<128x128xbf16>
    %353 = arith.truncf %351 : vector<4x128xf32> to vector<4x128xbf16>
    %cst_104 = arith.constant dense<0.000000e+00> : vector<4x128xf32>
    %354 = tpu.matmul %353, %352, %cst_104 {dimension_numbers = #tpu.dot_dimension_numbers<[1], [0], [0], [1], [0, 0, 1, 1], [], []>} : vector<4x128xbf16>, vector<128x128xbf16>, vector<4x128xf32> -> vector<4x128xf32>
    %c30 = arith.constant 30 : index
    %c0_105 = arith.constant 0 : index
    %355 = vector.load %arg3[%c30, %c0_105] : memref<40x128xf32, #tpu.memory_space<vmem>>, vector<1x128xf32>
    %356 = vector.broadcast %355 : vector<1x128xf32> to vector<4x128xf32>
    %357 = arith.addf %354, %356 : vector<4x128xf32>
    %c1408 = arith.constant 1408 : index
    %c0_106 = arith.constant 0 : index
    %358 = vector.load %arg2[%c1408, %c0_106] : memref<1792x128xbf16, #tpu.memory_space<vmem>>, vector<128x128xbf16>
    %359 = vector.extract_strided_slice %358 {offsets = [0, 0], sizes = [32, 128], strides = [1, 1]} : vector<128x128xbf16> to vector<32x128xbf16>
    %360 = vector.shape_cast %359 : vector<32x128xbf16> to vector<4x8x128xbf16>
    %361 = vector.extract_strided_slice %357 {offsets = [0, 0], sizes = [4, 8], strides = [1, 1]} : vector<4x128xf32> to vector<4x8xf32>
    %362 = vector.shape_cast %361 : vector<4x8xf32> to vector<1x4x8xf32>
    %363 = vector.extract_strided_slice %357 {offsets = [0, 8], sizes = [4, 8], strides = [1, 1]} : vector<4x128xf32> to vector<4x8xf32>
    %364 = vector.shape_cast %363 : vector<4x8xf32> to vector<1x4x8xf32>
    %365 = vector.extract_strided_slice %357 {offsets = [0, 16], sizes = [4, 8], strides = [1, 1]} : vector<4x128xf32> to vector<4x8xf32>
    %366 = vector.shape_cast %365 : vector<4x8xf32> to vector<1x4x8xf32>
    %367 = vector.extract_strided_slice %357 {offsets = [0, 24], sizes = [4, 8], strides = [1, 1]} : vector<4x128xf32> to vector<4x8xf32>
    %368 = vector.shape_cast %367 : vector<4x8xf32> to vector<1x4x8xf32>
    %369 = tpu.concatenate %362, %364, %366, %368 in 0 : vector<1x4x8xf32>, vector<1x4x8xf32>, vector<1x4x8xf32>, vector<1x4x8xf32> -> vector<4x4x8xf32>
    %370 = arith.truncf %369 : vector<4x4x8xf32> to vector<4x4x8xbf16>
    %371 = vector.extract_strided_slice %357 {offsets = [0, 32], sizes = [4, 8], strides = [1, 1]} : vector<4x128xf32> to vector<4x8xf32>
    %372 = vector.shape_cast %371 : vector<4x8xf32> to vector<1x4x8xf32>
    %373 = vector.extract_strided_slice %357 {offsets = [0, 40], sizes = [4, 8], strides = [1, 1]} : vector<4x128xf32> to vector<4x8xf32>
    %374 = vector.shape_cast %373 : vector<4x8xf32> to vector<1x4x8xf32>
    %375 = vector.extract_strided_slice %357 {offsets = [0, 48], sizes = [4, 8], strides = [1, 1]} : vector<4x128xf32> to vector<4x8xf32>
    %376 = vector.shape_cast %375 : vector<4x8xf32> to vector<1x4x8xf32>
    %377 = vector.extract_strided_slice %357 {offsets = [0, 56], sizes = [4, 8], strides = [1, 1]} : vector<4x128xf32> to vector<4x8xf32>
    %378 = vector.shape_cast %377 : vector<4x8xf32> to vector<1x4x8xf32>
    %379 = tpu.concatenate %372, %374, %376, %378 in 0 : vector<1x4x8xf32>, vector<1x4x8xf32>, vector<1x4x8xf32>, vector<1x4x8xf32> -> vector<4x4x8xf32>
    %380 = arith.truncf %379 : vector<4x4x8xf32> to vector<4x4x8xbf16>
    %381 = vector.extract_strided_slice %357 {offsets = [0, 64], sizes = [4, 8], strides = [1, 1]} : vector<4x128xf32> to vector<4x8xf32>
    %382 = vector.shape_cast %381 : vector<4x8xf32> to vector<1x4x8xf32>
    %383 = vector.extract_strided_slice %357 {offsets = [0, 72], sizes = [4, 8], strides = [1, 1]} : vector<4x128xf32> to vector<4x8xf32>
    %384 = vector.shape_cast %383 : vector<4x8xf32> to vector<1x4x8xf32>
    %385 = vector.extract_strided_slice %357 {offsets = [0, 80], sizes = [4, 8], strides = [1, 1]} : vector<4x128xf32> to vector<4x8xf32>
    %386 = vector.shape_cast %385 : vector<4x8xf32> to vector<1x4x8xf32>
    %387 = vector.extract_strided_slice %357 {offsets = [0, 88], sizes = [4, 8], strides = [1, 1]} : vector<4x128xf32> to vector<4x8xf32>
    %388 = vector.shape_cast %387 : vector<4x8xf32> to vector<1x4x8xf32>
    %389 = tpu.concatenate %382, %384, %386, %388 in 0 : vector<1x4x8xf32>, vector<1x4x8xf32>, vector<1x4x8xf32>, vector<1x4x8xf32> -> vector<4x4x8xf32>
    %390 = arith.truncf %389 : vector<4x4x8xf32> to vector<4x4x8xbf16>
    "tpu.trace_start"() <{level = 10 : i32, message = "gqe,gke->gqk"}> : () -> ()
    %cst_107 = arith.constant dense<0.000000e+00> : vector<4x4x4xf32>
    %391 = tpu.matmul %370, %380, %cst_107 {dimension_numbers = #tpu.dot_dimension_numbers<[2], [2], [1], [1], [0, 0, 0, 1, 1, 1], [0], [0]>} : vector<4x4x8xbf16>, vector<4x4x8xbf16>, vector<4x4x4xf32> -> vector<4x4x4xf32>
    "tpu.trace_stop"() : () -> ()
    %cst_108 = arith.constant 0.353553385 : f32
    %392 = vector.broadcast %cst_108 : f32 to vector<4x4x4xf32>
    %393 = arith.mulf %391, %392 : vector<4x4x4xf32>
    %cst_109 = arith.constant dense<0xFF800000> : vector<4x4xf32>
    %394 = vector.multi_reduction <maximumf>, %393, %cst_109 [2] : vector<4x4x4xf32> to vector<4x4xf32>
    %395 = vector.shape_cast %394 : vector<4x4xf32> to vector<4x4x1xf32>
    %396 = vector.broadcast %395 : vector<4x4x1xf32> to vector<4x4x4xf32>
    %397 = arith.subf %393, %396 : vector<4x4x4xf32>
    %398 = math.exp %397 : vector<4x4x4xf32>
    %cst_110 = arith.constant dense<0.000000e+00> : vector<4x4xf32>
    %399 = vector.multi_reduction <add>, %398, %cst_110 [2] : vector<4x4x4xf32> to vector<4x4xf32>
    %400 = vector.shape_cast %399 : vector<4x4xf32> to vector<4x4x1xf32>
    %401 = tpu.reciprocal %400 {approx = true} : vector<4x4x1xf32> -> vector<4x4x1xf32>
    %402 = vector.broadcast %401 : vector<4x4x1xf32> to vector<4x4x4xf32>
    %403 = arith.mulf %398, %402 : vector<4x4x4xf32>
    %404 = arith.truncf %403 : vector<4x4x4xf32> to vector<4x4x4xbf16>
    "tpu.trace_start"() <{level = 10 : i32, message = "gqk,gke->gqe"}> : () -> ()
    %cst_111 = arith.constant dense<0.000000e+00> : vector<4x4x8xf32>
    %405 = tpu.matmul %404, %390, %cst_111 {dimension_numbers = #tpu.dot_dimension_numbers<[2], [1], [1], [2], [0, 0, 0, 1, 1, 2], [0], [0]>} : vector<4x4x4xbf16>, vector<4x4x8xbf16>, vector<4x4x8xf32> -> vector<4x4x8xf32>
    "tpu.trace_stop"() : () -> ()
    %406 = arith.truncf %405 : vector<4x4x8xf32> to vector<4x4x8xbf16>
    "tpu.trace_start"() <{level = 10 : i32, message = "hme,heo->hmo"}> : () -> ()
    %cst_112 = arith.constant dense<0.000000e+00> : vector<4x4x128xf32>
    %407 = tpu.matmul %406, %360, %cst_112 {dimension_numbers = #tpu.dot_dimension_numbers<[2], [1], [1], [2], [0, 0, 0, 1, 1, 2], [0], [0]>} : vector<4x4x8xbf16>, vector<4x8x128xbf16>, vector<4x4x128xf32> -> vector<4x4x128xf32>
    "tpu.trace_stop"() : () -> ()
    %408 = vector.extract_strided_slice %407 {offsets = [0, 0, 0], sizes = [1, 4, 128], strides = [1, 1, 1]} : vector<4x4x128xf32> to vector<1x4x128xf32>
    %409 = vector.shape_cast %408 : vector<1x4x128xf32> to vector<4x128xf32>
    %410 = vector.extract_strided_slice %407 {offsets = [1, 0, 0], sizes = [1, 4, 128], strides = [1, 1, 1]} : vector<4x4x128xf32> to vector<1x4x128xf32>
    %411 = vector.shape_cast %410 : vector<1x4x128xf32> to vector<4x128xf32>
    %412 = arith.addf %409, %411 : vector<4x128xf32>
    %413 = vector.extract_strided_slice %407 {offsets = [2, 0, 0], sizes = [1, 4, 128], strides = [1, 1, 1]} : vector<4x4x128xf32> to vector<1x4x128xf32>
    %414 = vector.shape_cast %413 : vector<1x4x128xf32> to vector<4x128xf32>
    %415 = arith.addf %412, %414 : vector<4x128xf32>
    %416 = vector.extract_strided_slice %407 {offsets = [3, 0, 0], sizes = [1, 4, 128], strides = [1, 1, 1]} : vector<4x4x128xf32> to vector<1x4x128xf32>
    %417 = vector.shape_cast %416 : vector<1x4x128xf32> to vector<4x128xf32>
    %418 = arith.addf %415, %417 : vector<4x128xf32>
    %419 = arith.addf %324, %418 : vector<4x128xf32>
    %c31 = arith.constant 31 : index
    %c0_113 = arith.constant 0 : index
    %420 = vector.load %arg3[%c31, %c0_113] : memref<40x128xf32, #tpu.memory_space<vmem>>, vector<1x128xf32>
    %421 = vector.broadcast %420 : vector<1x128xf32> to vector<4x128xf32>
    %422 = arith.addf %419, %421 : vector<4x128xf32>
    %c28 = arith.constant 28 : index
    %c0_114 = arith.constant 0 : index
    %423 = vector.load %arg3[%c28, %c0_114] : memref<40x128xf32, #tpu.memory_space<vmem>>, vector<1x128xf32>
    %c29 = arith.constant 29 : index
    %c0_115 = arith.constant 0 : index
    %424 = vector.load %arg3[%c29, %c0_115] : memref<40x128xf32, #tpu.memory_space<vmem>>, vector<1x128xf32>
    %cst_116 = arith.constant dense<0.000000e+00> : vector<4xf32>
    %425 = vector.multi_reduction <add>, %422, %cst_116 [1] : vector<4x128xf32> to vector<4xf32>
    %426 = vector.shape_cast %425 : vector<4xf32> to vector<4x1xf32>
    %cst_117 = arith.constant 3.125000e-02 : f32
    %427 = vector.broadcast %cst_117 : f32 to vector<4x1xf32>
    %428 = arith.mulf %426, %427 : vector<4x1xf32>
    %429 = arith.mulf %422, %422 : vector<4x128xf32>
    %cst_118 = arith.constant dense<0.000000e+00> : vector<4xf32>
    %430 = vector.multi_reduction <add>, %429, %cst_118 [1] : vector<4x128xf32> to vector<4xf32>
    %431 = vector.shape_cast %430 : vector<4xf32> to vector<4x1xf32>
    %cst_119 = arith.constant 3.125000e-02 : f32
    %432 = vector.broadcast %cst_119 : f32 to vector<4x1xf32>
    %433 = arith.mulf %431, %432 : vector<4x1xf32>
    %434 = arith.mulf %428, %428 : vector<4x1xf32>
    %435 = arith.subf %433, %434 : vector<4x1xf32>
    %436 = vector.broadcast %428 : vector<4x1xf32> to vector<4x128xf32>
    %437 = arith.subf %422, %436 : vector<4x128xf32>
    %cst_120 = arith.constant 9.99999974E-6 : f32
    %438 = vector.broadcast %cst_120 : f32 to vector<4x1xf32>
    %439 = arith.addf %435, %438 : vector<4x1xf32>
    %440 = math.rsqrt %439 : vector<4x1xf32>
    %441 = vector.broadcast %440 : vector<4x1xf32> to vector<4x128xf32>
    %442 = arith.mulf %437, %441 : vector<4x128xf32>
    %443 = vector.broadcast %423 : vector<1x128xf32> to vector<4x128xf32>
    %444 = arith.mulf %442, %443 : vector<4x128xf32>
    %445 = vector.broadcast %424 : vector<1x128xf32> to vector<4x128xf32>
    %446 = arith.addf %444, %445 : vector<4x128xf32>
    %c1536 = arith.constant 1536 : index
    %c0_121 = arith.constant 0 : index
    %447 = vector.load %arg2[%c1536, %c0_121] : memref<1792x128xbf16, #tpu.memory_space<vmem>>, vector<128x128xbf16>
    %448 = arith.truncf %446 : vector<4x128xf32> to vector<4x128xbf16>
    %cst_122 = arith.constant dense<0.000000e+00> : vector<4x128xf32>
    %449 = tpu.matmul %448, %447, %cst_122 {dimension_numbers = #tpu.dot_dimension_numbers<[1], [0], [0], [1], [0, 0, 1, 1], [], []>} : vector<4x128xbf16>, vector<128x128xbf16>, vector<4x128xf32> -> vector<4x128xf32>
    %c33 = arith.constant 33 : index
    %c0_123 = arith.constant 0 : index
    %450 = vector.load %arg3[%c33, %c0_123] : memref<40x128xf32, #tpu.memory_space<vmem>>, vector<1x128xf32>
    %451 = vector.broadcast %450 : vector<1x128xf32> to vector<4x128xf32>
    %452 = arith.addf %449, %451 : vector<4x128xf32>
    %cst_124 = arith.constant 0.000000e+00 : f32
    %453 = vector.broadcast %cst_124 : f32 to vector<4x128xf32>
    %454 = arith.maximumf %452, %453 : vector<4x128xf32>
    %c1664 = arith.constant 1664 : index
    %c0_125 = arith.constant 0 : index
    %455 = vector.load %arg2[%c1664, %c0_125] : memref<1792x128xbf16, #tpu.memory_space<vmem>>, vector<128x128xbf16>
    %456 = arith.truncf %454 : vector<4x128xf32> to vector<4x128xbf16>
    %cst_126 = arith.constant dense<0.000000e+00> : vector<4x128xf32>
    %457 = tpu.matmul %456, %455, %cst_126 {dimension_numbers = #tpu.dot_dimension_numbers<[1], [0], [0], [1], [0, 0, 1, 1], [], []>} : vector<4x128xbf16>, vector<128x128xbf16>, vector<4x128xf32> -> vector<4x128xf32>
    %458 = arith.addf %422, %457 : vector<4x128xf32>
    %c32 = arith.constant 32 : index
    %c0_127 = arith.constant 0 : index
    %459 = vector.load %arg3[%c32, %c0_127] : memref<40x128xf32, #tpu.memory_space<vmem>>, vector<1x128xf32>
    %460 = vector.broadcast %459 : vector<1x128xf32> to vector<4x128xf32>
    %461 = arith.addf %458, %460 : vector<4x128xf32>
    %462 = vector.shape_cast %461 : vector<4x128xf32> to vector<1x4x128xf32>
    %c0_128 = arith.constant 0 : index
    %c0_129 = arith.constant 0 : index
    %c0_130 = arith.constant 0 : index
    %463 = vector.load %arg4[%c0_128, %c0_129, %c0_130] : memref<1x4x128xf32, #tpu.memory_space<vmem>>, vector<1x4x128xf32>
    tpu.vector_store %arg4[%c0_128, %c0_129, %c0_130], %462 {strides = array<i32>} : memref<1x4x128xf32, #tpu.memory_space<vmem>>, vector<1x4x128xf32>,
    return
  }
  func.func @transform_0(%arg0: i32) -> (i32, i32, i32) {
    %c0_i32 = arith.constant 0 : i32
    %c0_i32_0 = arith.constant 0 : i32
    %c0_i32_1 = arith.constant 0 : i32
    return %arg0, %c0_i32, %c0_i32_0 : i32, i32, i32
  }
  func.func @transform_1(%arg0: i32) -> (i32, i32) {
    %c0_i32 = arith.constant 0 : i32
    %c0_i32_0 = arith.constant 0 : i32
    %c0_i32_1 = arith.constant 0 : i32
    return %c0_i32, %c0_i32_0 : i32, i32
  }
  func.func @transform_2(%arg0: i32) -> (i32, i32) {
    %c0_i32 = arith.constant 0 : i32
    %c0_i32_0 = arith.constant 0 : i32
    %c0_i32_1 = arith.constant 0 : i32
    return %c0_i32, %c0_i32_0 : i32, i32
  }
  func.func @transform_3(%arg0: i32) -> (i32, i32, i32) {
    %c0_i32 = arith.constant 0 : i32
    %c0_i32_0 = arith.constant 0 : i32
    %c0_i32_1 = arith.constant 0 : i32
    return %arg0, %c0_i32, %c0_i32_0 : i32, i32, i32
  }
  func.func @transform_4(%arg0: i32) -> (i32, i32, i32) {
    %c0_i32 = arith.constant 0 : i32
    %c0_i32_0 = arith.constant 0 : i32
    %c0_i32_1 = arith.constant 0 : i32
    return %arg0, %c0_i32, %c0_i32_0 : i32, i32, i32
  }
}

</mosaic_0001>

<bundles_post_ra>
// kernel: constituentnet_perceiver_forward.1
= control target key start
LH: loop header
LB: loop body
LE: loop exit
PB: predicated region body
PF: predicated region fallthrough
CT: control target
= control target key end

     0   :  { %s4155_s15 = smov 0   ;;  %s4951_s0 = inlined_call_operand.vmem [shape: f32[2,8,128], index: 0, kind: input, shape index: {}]   ;;  %s4952_s1 = inlined_call_operand.vmem [shape: bf16[1792,128], index: 1, kind: input, shape index: {}]   ;;  %s4953_s2 = inlined_call_operand.vmem [shape: f32[40,128], index: 2, kind: input, shape index: {}]   ;;  %s4954_s3 = inlined_call_operand.vmem [shape: f32[2,4,128], index: 3, kind: output, shape index: {0}]   ;;  %s4955_s4 = inlined_call_operand.vmem [shape: f32[2,4,128], index: 4, kind: output, shape index: {1}]  }
   0x1 LB: > { %s3272_s16 = sadd.s32 4294967295, %s4121_s15   ;;  %p3276_p0 = scmp.ge.s32.totalorder %s4121_s15, 1  ;;  %s4121_s15 = sphi %s4155_s15, %s15_s15  }
   0x2   : > { %p164_p1 = scmp.lt.s32.totalorder %s4121_s15, 3 }
   0x4   : > { %p165_p2 = pnand %p3276_p0, %p164_p1 }
   0x5   : > { %p192_p3 = scmp.lt.s32.totalorder (!%p165_p2), %s3272_s16, 1  ;;  %s4126_s25 = smov (!%p165_p2), 112  }
   0x6   : > { %168 = sbr.rel (%p165_p2) target bundleno = 6824 (0x1aa8), region = 32  ;;  %s4127_s26 = smov (!%p165_p2), 120  }
   0x7   : > { %s4128_s27 = smov (!%p165_p2), 104   ;;  %s4129_s28 = smov (!%p165_p2), 64  }
   0xb   : > { %v4166_v0 = vld [vmem:[%s4953_s2] sm:$0xf]  ;;  %vm209_vm0 = vcmask 1043456   ;;  %s4957_s16 = smov (!%p192_p3, %s3272_s16), 1  ;;  %v3977_v6 = vld [vmem:[%s4952_s1 + $0x38] sm:$0xff]   ;;  %v4123_v7 = vmov 0.0  }
   0xc   : > { %v210_v1 = vsel %vm209_vm0, %v4166_v0, 0.0  ;;  %v214_v2 = vmul.f32 %v4166_v0, %v4166_v0  ;;  %s3277_s19 = sshll.u32 %s4957_s16, 3  ;;  %3578 = vmatprep.subr.bf16.mxu0 %v4123_v7  ;;  %3598 = vmatprep.subr.bf16.mxu1 %v4123_v7  ;;  %v3978_v8 = vld [vmem:[%s4952_s1 + $0x30] sm:$0xff]   ;;  %v3979_v9 = vld [vmem:[%s4952_s1 + $0x78] sm:$0xff]   ;;  %v3980_v10 = vld [vmem:[%s4952_s1 + $0x28] sm:$0xff]   ;;  %vm4124_vm1 = vmmov 0  }
   0xd   : > { %211 = vadd.xlane.f32.xlu1 %v210_v1  ;;  %s195_s22 = scalar_lea.vmem %s4951_s0, %s3277_s19  ;;  %3579 = vmatpush3.bf16.msra.mxu0 %v3977_v6  ;;  %v3981_v11 = vld [vmem:[%s4952_s1 + $0x70] sm:$0xff]   ;;  %v3982_v12 = vld [vmem:[%s4952_s1 + $0x20] sm:$0xff]   ;;  %v3983_v13 = vld [vmem:[%s4952_s1 + $0x68] sm:$0xff]   ;;  %vm486_vm2 = vcmask 261120   ;;  %vm534_vm3 = vcmask 60416   ;;  %s4125_s19 = smov 96  }
   0xe   : > { %v215_v3 = vsel %vm209_vm0, %v214_v2, 0.0  ;;  %v4179_v4 = vld [vmem:[%s195_s22] sm:$0xff]  ;;  %3580 = vmatprep.subr.bf16.mxu0 %v4123_v7  ;;  %3599 = vmatpush3.bf16.msra.mxu1 %v3979_v9  ;;  %v3984_v14 = vld [vmem:[%s4952_s1 + $0x18] sm:$0xff]   ;;  %v3986_v16 = vld [vmem:[%s4952_s1 + $0x10] sm:$0xff]   ;;  %vm550_vm4 = vcmask 64512   ;;  %vm1015_vm5 = vcmask 27648  }
   0xf   : > { %237 = vadd.xlane.f32.xlu0 %v4179_v4  ;;  %v240_v5 = vmul.f32 %v4179_v4, %v4179_v4  ;;  %3600 = vmatprep.subr.bf16.mxu1 %v4123_v7  ;;  %v3985_v15 = vld [vmem:[%s4952_s1 + $0x60] sm:$0xff]   ;;  %v3987_v17 = vld [vmem:[%s4952_s1 + $0x58] sm:$0xff]   ;;  %v3988_v18 = vld [vmem:[%s4952_s1 + $0x8] sm:$0xff]   ;;  %vm1070_vm6 = vcmask 1041408   ;;  %vm1066_vm7 = vcmask 31744   ;;  %s3278_s30 = sshll.u32 %s4957_s16, 2 }
  0x10   : > { %3594 = vmatprep.mubr.msk.bf16.mxu0 %vm4124_vm1, %v4123_v7  ;;  %3614 = vmatprep.mubr.msk.bf16.mxu1 %vm4124_vm1, %v4123_v7  ;;  %v3989_v19 = vld [vmem:[%s4952_s1 + $0x50] sm:$0xff]   ;;  %v3990_v20 = vld [vmem:[%s4952_s1] sm:$0xff]   ;;  %v3991_v21 = vld [vmem:[%s4952_s1 + $0x48] sm:$0xff]   ;;  %s203_s7 = scalar_lea.vmem %s4955_s4, %s3278_s30  ;;  %s199_s20 = scalar_lea.vmem %s4954_s3, %s3278_s30 }
  0x11   : > { %216 = vadd.xlane.f32.xlu1 %v215_v3  ;;  %3581 = vmatpush3.bf16.msra.mxu0 %v3978_v8  ;;  %v3992_v22 = vld [vmem:[%s4952_s1 + $0x40] sm:$0xff]   ;;  %v3293_v55 = vld [vmem:[%s4953_s2 + $0xa] ss:$0 sm:$0xff]  ;;  %v3284_v62 = vld [vmem:[%s4953_s2 + $0x8] ss:$0 sm:$0xff] }
  0x12   : > { %3582 = vmatprep.subr.bf16.mxu0 %v4123_v7  ;;  %3601 = vmatpush3.bf16.msra.mxu1 %v3981_v11  ;;  %v3280_v39 = vld [vmem:[%s4953_s2 + $0x4] ss:$0 sm:$0xff]  ;;  %v3281_v41 = vld [vmem:[%s4953_s2 + $0x5] ss:$0 sm:$0xff]  ;;  %v3282_v46 = vld [vmem:[%s4953_s2 + $0x6] ss:$0 sm:$0xff] }
  0x13   : > { %241 = vadd.xlane.f32.xlu0 %v240_v5  ;;  %3602 = vmatprep.subr.bf16.mxu1 %v4123_v7  ;;  %v3283_v49 = vld [vmem:[%s4953_s2 + $0x7] ss:$0 sm:$0xff] }
  0x15   : > { %3583 = vmatpush3.bf16.msra.mxu0 %v3980_v10 }
  0x16   : > { %3584 = vmatprep.subr.bf16.mxu0 %v4123_v7  ;;  %3603 = vmatpush3.bf16.msra.mxu1 %v3983_v13 }
  0x17   : > { %3604 = vmatprep.subr.bf16.mxu1 %v4123_v7 }
  0x19   : > { %3585 = vmatpush3.bf16.msra.mxu0 %v3982_v12 }
  0x1a   : > { %3586 = vmatprep.subr.bf16.mxu0 %v4123_v7  ;;  %3605 = vmatpush3.bf16.msra.mxu1 %v3985_v15 }
  0x1b   : > { %3606 = vmatprep.subr.bf16.mxu1 %v4123_v7 }
  0x1d   : > { %3587 = vmatpush3.bf16.msra.mxu0 %v3984_v14 }
  0x1e   : > { %3588 = vmatprep.subr.bf16.mxu0 %v4123_v7  ;;  %3607 = vmatpush3.bf16.msra.mxu1 %v3987_v17 }
  0x1f   : > { %3608 = vmatprep.subr.bf16.mxu1 %v4123_v7 }
  0x21   : > { %3589 = vmatpush3.bf16.msra.mxu0 %v3986_v16 }
  0x22   : > { %3590 = vmatprep.subr.bf16.mxu0 %v4123_v7  ;;  %3609 = vmatpush3.bf16.msra.mxu1 %v3989_v19  ;;  %v3993_v19 = vld [vmem:[%s4952_s1 + $0x88] sm:$0xff]  }
  0x23   : > { %3610 = vmatprep.subr.bf16.mxu1 %v4123_v7 }
  0x25   : > { %3591 = vmatpush3.bf16.msra.mxu0 %v3988_v18 }
  0x26   : > { %3592 = vmatprep.subr.bf16.mxu0 %v4123_v7  ;;  %3611 = vmatpush3.bf16.msra.mxu1 %v3991_v21 }
  0x27   : > { %3612 = vmatprep.subr.bf16.mxu1 %v4123_v7 }
  0x29   : > { %3593 = vmatpush3.bf16.msra.mxu0 %v3990_v20 }
  0x2a   : > { %3618 = vmatprep.subr.bf16.mxu0 %v4123_v7  ;;  %3613 = vmatpush3.bf16.msra.mxu1 %v3992_v22 }
  0x2b   : > { %3624 = vmatprep.subr.bf16.mxu1 %v4123_v7 }
  0x96   : > { %v212_v23 = vpop.xlane.xlu1 %211 }
  0x97   : > { %v213_v24 = vmul.f32 0.03125, %v212_v23 }
  0x98   : > { %v238_v28 = vpop.xlane.xlu0 %237 }
  0x99   : > { %v219_v25 = vmul.f32 %v213_v24, %v213_v24  ;;  %v239_v29 = vmul.f32 0.0625, %v238_v28  ;;  %v221_v37 = vsub.f32 %v4166_v0, %v213_v24  ;;  %v3994_v24 = vld [vmem:[%s4952_s1 + $0x80] sm:$0xff]  }
  0x9a   : > { %v217_v26 = vpop.xlane.xlu1 %216 }
  0x9b   : > { %v218_v27 = vmul.f32 0.03125, %v217_v26  ;;  %v244_v33 = vmul.f32 %v239_v29, %v239_v29  ;;  %v246_v43 = vsub.f32 %v4179_v4, %v239_v29 }
  0x9c   : > { %v242_v32 = vpop.xlane.xlu0 %241 }
  0x9d   : > { %v220_v30 = vsub.f32 %v218_v27, %v219_v25  ;;  %v243_v34 = vmul.f32 0.0625, %v242_v32 }
  0x9f   : > { %v222_v31 = vadd.f32 1e-05, %v220_v30  ;;  %v245_v35 = vsub.f32 %v243_v34, %v244_v33 }
  0xa1   : > { %4061 = vrsqrt.f32 %v222_v31  ;;  %v247_v36 = vadd.f32 1e-05, %v245_v35  ;;  %v3307_v31 = vld [vmem:[%s4953_s2 + $0x9] ss:$0 sm:$0xff] }
  0xa3   : > { %4063 = vrsqrt.f32 %v247_v36 }
  0xae   : > { %v4062_v38 = vpop.eup %4061 }
  0xaf   : > { %v224_v40 = vmul.f32 %v4062_v38, %v221_v37 }
  0xb0   : > { %v4064_v44 = vpop.eup %4063 }
  0xb1   : > { %v229_v42 = vmul.f32 %v3280_v39, %v224_v40  ;;  %v4265_v47 = vmul.f32 %v4064_v44, %v246_v43  ;;  %v3995_v40 = vld [vmem:[%s4952_s1 + $0xf8] sm:$0xff]   ;;  %v4000_v44 = vld [vmem:[%s4952_s1 + $0xd0] sm:$0xff]  }
  0xb2   : > { %v3999_v43 = vld [vmem:[%s4952_s1 + $0xd8] sm:$0xff]  }
  0xb3   : > { %v234_v45 = vadd.f32 %v3281_v41, %v229_v42  ;;  %v254_v50 = vmul.f32 %v3282_v46, %v4265_v47  ;;  %v3997_v41 = vld [vmem:[%s4952_s1 + $0xe8] sm:$0xff]   ;;  %v3998_v42 = vld [vmem:[%s4952_s1 + $0xe0] sm:$0xff]  }
  0xb4   : > { %v4002_v46 = vld [vmem:[%s4952_s1 + $0xc0] sm:$0xff]  }
  0xb5   : > { %v276_v48 = vpack.c.bf16 %v234_v45, %v234_v45  ;;  %v259_v51 = vadd.f32 %v3283_v49, %v254_v50  ;;  %v4001_v45 = vld [vmem:[%s4952_s1 + $0xc8] sm:$0xff]  }
  0xb7   : > { %3595 = vmatmul.mubr.bf16.vlgmr.msra.gmra.mxu0 %v276_v48  ;;  %v386_v52 = vpack.c.bf16 %v259_v51, %v259_v51 }
  0xb8   : > { %3620 = vmatprep.mubr.msk.bf16.mxu0 %vm4124_vm1, %v4123_v7 }
  0xb9   : > { %3615 = vmatmul.mubr.bf16.vlgmr.msra.gmra.mxu1 %v386_v52 }
  0xba   : > { %3626 = vmatprep.mubr.msk.bf16.mxu1 %vm4124_vm1, %v4123_v7 }
 0x177   : > { %v364_v53 = vpop.f32.mrf.mxu0 }
 0x178   : > { %v365_v3 = vadd.f32 %v3284_v62, %v364_v53 }
 0x179   : > { %v3596_v54 = vpop.f32.mrf.mxu0  ;;  %v474_v57 = vpop.f32.mrf.mxu1 }
 0x17a   : > { %v475_v58 = vadd.f32 %v3293_v55, %v474_v57  ;;  %v484_v4 = vpack.c.bf16 %v365_v3, %v365_v3  ;;  %v3308_v57 = vld [vmem:[%s4953_s2 + $0xb] ss:$0 sm:$0xff] }
 0x17b   : > { %v367_v56 = vpop.f32.mrf.mxu0  ;;  %v3616_v60 = vpop.f32.mrf.mxu1 }
 0x17c   : > { %v485_v61 = vpack.c.bf16 %v475_v58, %v475_v58 }
 0x17d   : > { %v3597_v59 = vpop.f32.mrf.mxu0  ;;  %v477_v63 = vpop.f32.mrf.mxu1 }
 0x17e   : > { %v491_v1 = vsel %vm486_vm2, %v485_v61, 0  ;;  %v3309_v59 = vld [vmem:[%s4953_s2 + $0xc] ss:$0 sm:$0xff]  ;;  %v3310_v63 = vld [vmem:[%s4953_s2 + $0xf] ss:$0 sm:$0xff] }
 0x17f   : > { %v3617_v2 = vpop.f32.mrf.mxu1  ;;  %3619 = vmatpush3.bf16.xpose.msra.mxu0 %v491_v1 }
 0x180   : > { %3630 = vmatprep.subr.bf16.mxu0 %v4123_v7 }
 0x186   : > { %3621 = vmatmul.mubr.msk.bf16.vlgmr.msra.gmra.mxu0 %vm486_vm2, %v484_v4 }
 0x187   : > { %3634 = vmatprep.mubr.msk.bf16.mxu0 %vm4124_vm1, %v4123_v7  ;;  %3631 = vmatpush3.bf16.msra.mxu0 %v3993_v19 }
 0x188   : > { %3632 = vmatprep.subr.bf16.mxu0 %v4123_v7 }
 0x18b   : > { %3633 = vmatpush3.bf16.msra.mxu0 %v3994_v24 }
 0x18c   : > { %3658 = vmatprep.subr.bf16.mxu0 %v4123_v7 }
 0x246   : > { %v527_v5 = vpop.f32.mrf.mxu0 }
 0x247   : > { %v533_v6 = vmul.f32 0.17677669, %v527_v5 }
 0x248   : > { %v3622_v8 = vpop.f32.mrf.mxu0 }
 0x249   : > { %v535_v9 = vsel %vm534_vm3, %v533_v6, -inf }
 0x24a   : > { %536 = vmax.xlane.f32.xlu0 %v535_v9  ;;  %v530_v10 = vpop.f32.mrf.mxu0 }
 0x24c   : > { %v3623_v11 = vpop.f32.mrf.mxu0 }
 0x260   : > { %548 = vrot.lane.b32.xlu0 %v485_v61, %s4125_s19 }
 0x2d3   : > { %v537_v12 = vpop.xlane.xlu0 %536 }
 0x2d4   : > { %v538_v13 = vsub.f32 %v533_v6, %v537_v12 }
 0x2d6   : > { %v539_v14 = vmul.f32 1.442695, %v538_v13 }
 0x2d7   : > { %v549_v15 = vpop.permute.xlu0 %548 }
 0x2d8   : > { %4065 = vpow2.f32 %v539_v14  ;;  %v555_v16 = vsel %vm209_vm0, %v549_v15, 0 }
 0x2d9   : > { %3625 = vmatpush3.bf16.msra.mxu1 %v555_v16 }
 0x2da   : > { %3638 = vmatprep.subr.bf16.mxu1 %v4123_v7 }
 0x2e5   : > { %v4066_v17 = vpop.eup %4065 }
 0x2e6   : > { %v541_v18 = vsel %vm534_vm3, %v4066_v17, 0.0 }
 0x2e7   : > { %542 = vadd.xlane.f32.xlu1 %v541_v18 }
 0x370   : > { %v543_v20 = vpop.xlane.xlu1 %542 }
 0x371   : > { %4067 = vrcp.f32 %v543_v20 }
 0x37e   : > { %v4068_v21 = vpop.eup %4067 }
 0x37f   : > { %v545_v22 = vmul.f32 %v4068_v21, %v4066_v17 }
 0x381   : > { %v546_v23 = vpack.c.bf16 %v545_v22, %v545_v22 }
 0x383   : > { %3627 = vmatmul.mubr.msk.bf16.vlgmr.msra.gmra.mxu1 %vm550_vm4, %v546_v23 }
 0x384   : > { %3654 = vmatprep.mubr.msk.bf16.mxu1 %vm4124_vm1, %v4123_v7  ;;  %3639 = vmatpush3.bf16.msra.mxu1 %v3995_v40 }
 0x385   : > { %3640 = vmatprep.subr.bf16.mxu1 %v4123_v7 }
 0x443   : > { %v591_v25 = vpop.f32.mrf.mxu1 }
 0x444   : > { %v597_v26 = vpack.c.bf16 %v591_v25, %v591_v25 }
 0x445   : > { %v3628_v27 = vpop.f32.mrf.mxu1 }
 0x446   : > { %3635 = vmatmul.mubr.msk.bf16.vlgmr.msra.gmra.mxu0 %vm486_vm2, %v597_v26 }
 0x447   : > { %v594_v28 = vpop.f32.mrf.mxu1  ;;  %3660 = vmatprep.mubr.msk.bf16.mxu0 %vm4124_vm1, %v4123_v7 }
 0x449   : > { %v3629_v29 = vpop.f32.mrf.mxu1 }
 0x506   : > { %v647_v30 = vpop.f32.mrf.mxu0 }
 0x507   : > { %v653_v32 = vadd.f32 %v647_v30, %v4166_v0  ;;  %v3996_v0 = vld [vmem:[%s4952_s1 + $0xf0] sm:$0xff]  }
 0x508   : > { %v3636_v33 = vpop.f32.mrf.mxu0  ;;  %3641 = vmatpush3.bf16.msra.mxu1 %v3996_v0 }
 0x509   : > { %v4309_v34 = vadd.f32 %v3307_v31, %v653_v32  ;;  %3642 = vmatprep.subr.bf16.mxu1 %v4123_v7 }
 0x50a   : > { %v650_v35 = vpop.f32.mrf.mxu0 }
 0x50b   : > { %v662_v36 = vsel %vm209_vm0, %v4309_v34, 0.0  ;;  %v666_v37 = vmul.f32 %v4309_v34, %v4309_v34 }
 0x50c   : > { %663 = vadd.xlane.f32.xlu1 %v662_v36  ;;  %v3637_v38 = vpop.f32.mrf.mxu0  ;;  %3643 = vmatpush3.bf16.msra.mxu1 %v3997_v41 }
 0x50d   : > { %v667_v39 = vsel %vm209_vm0, %v666_v37, 0.0  ;;  %3644 = vmatprep.subr.bf16.mxu1 %v4123_v7 }
 0x510   : > { %668 = vadd.xlane.f32.xlu1 %v667_v39  ;;  %3645 = vmatpush3.bf16.msra.mxu1 %v3998_v42 }
 0x511   : > { %3646 = vmatprep.subr.bf16.mxu1 %v4123_v7 }
 0x514   : > { %3647 = vmatpush3.bf16.msra.mxu1 %v3999_v43 }
 0x515   : > { %3648 = vmatprep.subr.bf16.mxu1 %v4123_v7 }
 0x518   : > { %3649 = vmatpush3.bf16.msra.mxu1 %v4000_v44 }
 0x519   : > { %3650 = vmatprep.subr.bf16.mxu1 %v4123_v7 }
 0x51c   : > { %3651 = vmatpush3.bf16.msra.mxu1 %v4001_v45 }
 0x51d   : > { %3652 = vmatprep.subr.bf16.mxu1 %v4123_v7 }
 0x520   : > { %3653 = vmatpush3.bf16.msra.mxu1 %v4002_v46 }
 0x521   : > { %3682 = vmatprep.subr.bf16.mxu1 %v4123_v7 }
 0x595   : > { %v664_v48 = vpop.xlane.xlu1 %663 }
 0x596   : > { %v665_v49 = vmul.f32 0.03125, %v664_v48 }
 0x598   : > { %v671_v51 = vmul.f32 %v665_v49, %v665_v49  ;;  %v673_v55 = vsub.f32 %v4309_v34, %v665_v49 }
 0x599   : > { %v669_v50 = vpop.xlane.xlu1 %668 }
 0x59a   : > { %v670_v52 = vmul.f32 0.03125, %v669_v50 }
 0x59c   : > { %v672_v53 = vsub.f32 %v670_v52, %v671_v51 }
 0x59e   : > { %v674_v54 = vadd.f32 1e-05, %v672_v53 }
 0x5a0   : > { %4069 = vrsqrt.f32 %v674_v54 }
 0x5ad   : > { %v4070_v56 = vpop.eup %4069 }
 0x5ae   : > { %v676_v58 = vmul.f32 %v4070_v56, %v673_v55 }
 0x5b0   : > { %v681_v60 = vmul.f32 %v3308_v57, %v676_v58 }
 0x5b2   : > { %v686_v61 = vadd.f32 %v3309_v59, %v681_v60 }
 0x5b4   : > { %v703_v62 = vpack.c.bf16 %v686_v61, %v686_v61 }
 0x5b6   : > { %3655 = vmatmul.mubr.bf16.vlgmr.msra.gmra.mxu1 %v703_v62 }
 0x5b7   : > { %3684 = vmatprep.mubr.msk.bf16.mxu1 %vm4124_vm1, %v4123_v7 }
 0x676   : > { %v791_v1 = vpop.f32.mrf.mxu1 }
 0x677   : > { %v792_v2 = vadd.f32 %v3310_v63, %v791_v1 }
 0x678   : > { %v3656_v3 = vpop.f32.mrf.mxu1 }
 0x679   : > { %805 = vrot.lane.b32.xlu0 %v792_v2, %s4126_s25  ;;  %802 = vrot.lane.b32.xlu1 %v792_v2, %s4127_s26  ;;  %v4362_v5 = vpack.c.bf16 %v792_v2, %v792_v2 }
 0x67a   : > { %v794_v4 = vpop.f32.mrf.mxu1 }
 0x67c   : > { %v3657_v6 = vpop.f32.mrf.mxu1 }
 0x67d   : > { %808 = vrot.lane.b32.xlu1 %v792_v2, %s4128_s27  ;;  %816 = vrot.lane.b32.xlu0 %v4362_v5, %s4125_s19 }
 0x6eb   : > { %v806_v8 = vpop.permute.xlu0 %805  ;;  %v803_v9 = vpop.permute.xlu1 %802 }
 0x6ec   : > { %v4367_v10 = vpack.c.bf16 %v806_v8, %v806_v8  ;;  %v4369_v11 = vpack.c.bf16 %v803_v9, %v803_v9 }
 0x6ee   : > { %865 = vrot.lane.b32.xlu1 %v4369_v11, %s4125_s19  ;;  %914 = vrot.lane.b32.xlu0 %v4367_v10, %s4125_s19 }
 0x6ef   : > { %v809_v12 = vpop.permute.xlu1 %808  ;;  %v817_v13 = vpop.permute.xlu0 %816 }
 0x6f0   : > { %v4375_v14 = vpack.c.bf16 %v809_v12, %v809_v12  ;;  %v822_v15 = vsel %vm550_vm4, %v817_v13, 0 }
 0x6f1   : > { %3659 = vmatpush3.bf16.xpose.msra.mxu0 %v822_v15 }
 0x6f2   : > { %963 = vrot.lane.b32.xlu1 %v4375_v14, %s4125_s19  ;;  %3664 = vmatprep.subr.bf16.mxu0 %v4123_v7 }
 0x6f8   : > { %3661 = vmatmul.mubr.msk.bf16.vlgmr.msra.gmra.mxu0 %vm550_vm4, %v4362_v5 }
 0x6f9   : > { %3666 = vmatprep.mubr.msk.bf16.mxu0 %vm4124_vm1, %v4123_v7 }
 0x760   : > { %v866_v16 = vpop.permute.xlu1 %865  ;;  %v915_v18 = vpop.permute.xlu0 %914 }
 0x761   : > { %v871_v17 = vsel %vm550_vm4, %v866_v16, 0  ;;  %v920_v19 = vsel %vm550_vm4, %v915_v18, 0 }
 0x762   : > { %3665 = vmatpush3.bf16.xpose.msra.mxu0 %v871_v17 }
 0x763   : > { %3670 = vmatprep.subr.bf16.mxu0 %v4123_v7 }
 0x764   : > { %v964_v20 = vpop.permute.xlu1 %963 }
 0x765   : > { %v969_v21 = vsel %vm550_vm4, %v964_v20, 0 }
 0x769   : > { %3667 = vmatmul.mubr.msk.bf16.vlgmr.msra.gmra.mxu0 %vm550_vm4, %v4369_v11 }
 0x76a   : > { %3671 = vmatpush3.bf16.xpose.msra.mxu0 %v920_v19  ;;  %3672 = vmatprep.mubr.msk.bf16.mxu0 %vm4124_vm1, %v4123_v7 }
 0x76b   : > { %3676 = vmatprep.subr.bf16.mxu0 %v4123_v7 }
 0x771   : > { %3673 = vmatmul.mubr.msk.bf16.vlgmr.msra.gmra.mxu0 %vm550_vm4, %v4367_v10 }
 0x772   : > { %3677 = vmatpush3.bf16.xpose.msra.mxu0 %v969_v21  ;;  %3678 = vmatprep.mubr.msk.bf16.mxu0 %vm4124_vm1, %v4123_v7 }
 0x773   : > { %3688 = vmatprep.subr.bf16.mxu0 %v4123_v7 }
 0x779   : > { %3679 = vmatmul.mubr.msk.bf16.vlgmr.msra.gmra.mxu0 %vm550_vm4, %v4375_v14 }
 0x77a   : > { %3690 = vmatprep.mubr.msk.bf16.mxu0 %vm4124_vm1, %v4123_v7 }
 0x7b8   : > { %v858_v22 = vpop.f32.mrf.mxu0 }
 0x7b9   : > { %v1011_v23 = vmul.f32 0.35355338, %v858_v22 }
 0x7ba   : > { %v3662_v24 = vpop.f32.mrf.mxu0 }
 0x7bb   : > { %v1016_v25 = vsel %vm1015_vm5, %v1011_v23, -inf }
 0x7bc   : > { %1017 = vmax.xlane.f32.xlu0 %v1016_v25  ;;  %v861_v26 = vpop.f32.mrf.mxu0 }
 0x7be   : > { %v3663_v27 = vpop.f32.mrf.mxu0 }
 0x829   : > { %v907_v28 = vpop.f32.mrf.mxu0 }
 0x82a   : > { %v1012_v29 = vmul.f32 0.35355338, %v907_v28 }
 0x82b   : > { %v3668_v30 = vpop.f32.mrf.mxu0 }
 0x82c   : > { %v1019_v31 = vsel %vm1015_vm5, %v1012_v29, -inf }
 0x82d   : > { %1020 = vmax.xlane.f32.xlu1 %v1019_v31  ;;  %v910_v32 = vpop.f32.mrf.mxu0  ;;  %v798_v31 = vld [vmem:[%s4952_s1 + $0x104] sm:$0xf] }
 0x82e   : > { %v1312_v32 = vsel %vm209_vm0, %v798_v31, 0  ;;  %v4014_v31 = vld [vmem:[%s4952_s1 + $0x1a0] sm:$0xff]  }
 0x82f   : > { %v3669_v33 = vpop.f32.mrf.mxu0 }
 0x830   : > { %v799_v33 = vld [vmem:[%s4952_s1 + $0x108] sm:$0xf] }
 0x831   : > { %v956_v35 = vpop.f32.mrf.mxu0 }
 0x832   : > { %v1013_v36 = vmul.f32 0.35355338, %v956_v35 }
 0x833   : > { %v3674_v37 = vpop.f32.mrf.mxu0 }
 0x834   : > { %v1022_v38 = vsel %vm1015_vm5, %v1013_v36, -inf }
 0x835   : > { %1023 = vmax.xlane.f32.xlu0 %v1022_v38  ;;  %v959_v39 = vpop.f32.mrf.mxu0  ;;  %v1358_v38 = vsel %vm209_vm0, %v799_v33, 0  ;;  %v4016_v33 = vld [vmem:[%s4952_s1 + $0x190] sm:$0xff]  }
 0x837   : > { %v3675_v40 = vpop.f32.mrf.mxu0 }
 0x839   : > { %v1005_v0 = vpop.f32.mrf.mxu0 }
 0x83a   : > { %v1014_v41 = vmul.f32 0.35355338, %v1005_v0 }
 0x83b   : > { %v3680_v42 = vpop.f32.mrf.mxu0 }
 0x83c   : > { %v1025_v43 = vsel %vm1015_vm5, %v1014_v41, -inf }
 0x83d   : > { %1026 = vmax.xlane.f32.xlu0 %v1025_v43  ;;  %v1008_v44 = vpop.f32.mrf.mxu0 }
 0x83f   : > { %v3681_v45 = vpop.f32.mrf.mxu0 }
 0x845   : > { %v1018_v46 = vpop.xlane.xlu0 %1017 }
 0x846   : > { %v1028_v48 = vsub.f32 %v1011_v23, %v1018_v46 }
 0x848   : > { %v1032_v49 = vmul.f32 1.442695, %v1028_v48 }
 0x84a   : > { %4071 = vpow2.f32 %v1032_v49 }
 0x857   : > { %v4072_v50 = vpop.eup %4071 }
 0x858   : > { %v1040_v51 = vsel %vm1015_vm5, %v4072_v50, 0.0 }
 0x859   : > { %1041 = vadd.xlane.f32.xlu0 %v1040_v51 }
 0x8b6   : > { %v1021_v52 = vpop.xlane.xlu1 %1020 }
 0x8b7   : > { %v1029_v53 = vsub.f32 %v1012_v29, %v1021_v52  ;;  %v797_v29 = vld [vmem:[%s4952_s1 + $0x100] sm:$0xf] }
 0x8b8   : > { %v1266_v30 = vsel %vm209_vm0, %v797_v29, 0  ;;  %v4012_v29 = vld [vmem:[%s4952_s1 + $0x1b0] sm:$0xff]  }
 0x8b9   : > { %v1034_v54 = vmul.f32 1.442695, %v1029_v53 }
 0x8bb   : > { %4073 = vpow2.f32 %v1034_v54 }
 0x8be   : > { %v1024_v55 = vpop.xlane.xlu0 %1023 }
 0x8bf   : > { %v1030_v56 = vsub.f32 %v1013_v36, %v1024_v55  ;;  %v800_v36 = vld [vmem:[%s4952_s1 + $0x10c] sm:$0xf] }
 0x8c1   : > { %v1036_v57 = vmul.f32 1.442695, %v1030_v56 }
 0x8c3   : > { %4075 = vpow2.f32 %v1036_v57 }
 0x8c6   : > { %v1027_v62 = vpop.xlane.xlu0 %1026 }
 0x8c7   : > { %v1031_v63 = vsub.f32 %v1014_v41, %v1027_v62  ;;  %v1404_v41 = vsel %vm209_vm0, %v800_v36, 0 }
 0x8c8   : > { %v4074_v58 = vpop.eup %4073 }
 0x8c9   : > { %v1043_v59 = vsel %vm1015_vm5, %v4074_v58, 0.0  ;;  %v1038_v1 = vmul.f32 1.442695, %v1031_v63 }
 0x8ca   : > { %1044 = vadd.xlane.f32.xlu1 %v1043_v59 }
 0x8cb   : > { %4077 = vpow2.f32 %v1038_v1 }
 0x8d0   : > { %v4076_v60 = vpop.eup %4075 }
 0x8d1   : > { %v1046_v61 = vsel %vm1015_vm5, %v4076_v60, 0.0 }
 0x8d2   : > { %1047 = vadd.xlane.f32.xlu0 %v1046_v61 }
 0x8d8   : > { %v4078_v2 = vpop.eup %4077 }
 0x8d9   : > { %v1049_v3 = vsel %vm1015_vm5, %v4078_v2, 0.0 }
 0x8db   : > { %1114 = vrot.lane.b32.xlu1 %v4369_v11, %s4129_s28 }
 0x8df   : > { %1162 = vrot.lane.b32.xlu1 %v4367_v10, %s4129_s28 }
 0x8e2   : > { %v1042_v4 = vpop.xlane.xlu0 %1041 }
 0x8e3   : > { %4079 = vrcp.f32 %v1042_v4 }
 0x8e8   : > { %1064 = vrot.lane.b32.xlu0 %v4362_v5, %s4129_s28 }
 0x8f0   : > { %v4080_v5 = vpop.eup %4079 }
 0x8f1   : > { %v1056_v11 = vmul.f32 %v4080_v5, %v4072_v50 }
 0x8f3   : > { %v1060_v16 = vpack.c.bf16 %v1056_v11, %v1056_v11 }
 0x903   : > { %1050 = vadd.xlane.f32.xlu1 %v1049_v3 }
 0x914   : > { %1210 = vrot.lane.b32.xlu1 %v4375_v14, %s4129_s28 }
 0x953   : > { %v1045_v6 = vpop.xlane.xlu1 %1044 }
 0x954   : > { %4081 = vrcp.f32 %v1045_v6 }
 0x957   : > { %v1115_v8 = vpop.permute.xlu1 %1114 }
 0x958   : > { %v1120_v9 = vsel %vm1070_vm6, %v1115_v8, 0 }
 0x959   : > { %3689 = vmatpush3.bf16.msra.mxu0 %v1120_v9 }
 0x95a   : > { %3700 = vmatprep.subr.bf16.mxu0 %v4123_v7 }
 0x95b   : > { %v1048_v10 = vpop.xlane.xlu0 %1047  ;;  %v1163_v14 = vpop.permute.xlu1 %1162 }
 0x95c   : > { %4083 = vrcp.f32 %v1048_v10  ;;  %v1168_v18 = vsel %vm1070_vm6, %v1163_v14, 0 }
 0x95f   : > { %v1065_v12 = vpop.permute.xlu0 %1064 }
 0x960   : > { %v1072_v13 = vsel %vm1070_vm6, %v1065_v12, 0 }
 0x961   : > { %v4082_v15 = vpop.eup %4081  ;;  %3683 = vmatpush3.bf16.msra.mxu1 %v1072_v13  ;;  %v3331_v13 = vld [vmem:[%s4953_s2 + $0x10] ss:$0 sm:$0xff] }
 0x962   : > { %3694 = vmatprep.subr.bf16.mxu1 %v4123_v7  ;;  %v1057_v17 = vmul.f32 %v4082_v15, %v4074_v58  ;;  %v4003_v58 = vld [vmem:[%s4952_s1 + $0x178] sm:$0xff]  }
 0x964   : > { %3685 = vmatmul.mubr.msk.bf16.vlgmr.msra.gmra.mxu1 %vm1066_vm7, %v1060_v16  ;;  %v1061_v19 = vpack.c.bf16 %v1057_v17, %v1057_v17 }
 0x965   : > { %3695 = vmatpush3.bf16.msra.mxu1 %v1168_v18  ;;  %3696 = vmatprep.mubr.msk.bf16.mxu1 %vm4124_vm1, %v4123_v7 }
 0x966   : > { %3691 = vmatmul.mubr.msk.bf16.vlgmr.msra.gmra.mxu0 %vm1066_vm7, %v1061_v19  ;;  %3706 = vmatprep.subr.bf16.mxu1 %v4123_v7 }
 0x967   : > { %3702 = vmatprep.mubr.msk.bf16.mxu0 %vm4124_vm1, %v4123_v7 }
 0x969   : > { %v4084_v20 = vpop.eup %4083 }
 0x96a   : > { %v1058_v21 = vmul.f32 %v4084_v20, %v4076_v60 }
 0x96c   : > { %v1062_v22 = vpack.c.bf16 %v1058_v21, %v1058_v21 }
 0x96e   : > { %3697 = vmatmul.mubr.msk.bf16.vlgmr.msra.gmra.mxu1 %vm1066_vm7, %v1062_v22  ;;  %v4004_v22 = vld [vmem:[%s4952_s1 + $0x170] sm:$0xff]  }
 0x96f   : > { %3708 = vmatprep.mubr.msk.bf16.mxu1 %vm4124_vm1, %v4123_v7  ;;  %3707 = vmatpush3.bf16.msra.mxu1 %v1266_v30  ;;  %v4013_v30 = vld [vmem:[%s4952_s1 + $0x1a8] sm:$0xff]  }
 0x970   : > { %3718 = vmatprep.subr.bf16.mxu1 %v4123_v7 }
 0x98c   : > { %v1051_v23 = vpop.xlane.xlu1 %1050 }
 0x98d   : > { %4085 = vrcp.f32 %v1051_v23  ;;  %v4006_v23 = vld [vmem:[%s4952_s1 + $0x160] sm:$0xff]  }
 0x990   : > { %v1211_v24 = vpop.permute.xlu1 %1210 }
 0x991   : > { %v1216_v25 = vsel %vm1070_vm6, %v1211_v24, 0  ;;  %v4007_v24 = vld [vmem:[%s4952_s1 + $0x158] sm:$0xff]  }
 0x992   : > { %3701 = vmatpush3.bf16.msra.mxu0 %v1216_v25  ;;  %v4008_v25 = vld [vmem:[%s4952_s1 + $0x150] sm:$0xff]  }
 0x993   : > { %3712 = vmatprep.subr.bf16.mxu0 %v4123_v7 }
 0x99a   : > { %v4086_v26 = vpop.eup %4085 }
 0x99b   : > { %v1059_v27 = vmul.f32 %v4086_v26, %v4078_v2  ;;  %v4009_v26 = vld [vmem:[%s4952_s1 + $0x148] sm:$0xff]  }
 0x99d   : > { %v1063_v28 = vpack.c.bf16 %v1059_v27, %v1059_v27  ;;  %v4010_v27 = vld [vmem:[%s4952_s1 + $0x140] sm:$0xff]  }
 0x99f   : > { %3703 = vmatmul.mubr.msk.bf16.vlgmr.msra.gmra.mxu0 %vm1066_vm7, %v1063_v28  ;;  %v4011_v28 = vld [vmem:[%s4952_s1 + $0x1b8] sm:$0xff]  }
 0x9a0   : > { %3714 = vmatprep.mubr.msk.bf16.mxu0 %vm4124_vm1, %v4123_v7  ;;  %3713 = vmatpush3.bf16.msra.mxu0 %v1312_v32  ;;  %v4015_v32 = vld [vmem:[%s4952_s1 + $0x198] sm:$0xff]  }
 0x9a1   : > { %3724 = vmatprep.subr.bf16.mxu0 %v4123_v7 }
 0xa24   : > { %v1108_v35 = vpop.f32.mrf.mxu1 }
 0xa25   : > { %v1258_v37 = vpack.c.bf16 %v1108_v35, %v1108_v35  ;;  %v4017_v35 = vld [vmem:[%s4952_s1 + $0x188] sm:$0xff]  }
 0xa26   : > { %v3686_v39 = vpop.f32.mrf.mxu1  ;;  %v1156_v40 = vpop.f32.mrf.mxu0 }
 0xa27   : > { %v1259_v0 = vpack.c.bf16 %v1156_v40, %v1156_v40  ;;  %3709 = vmatmul.mubr.msk.bf16.vlgmr.msra.gmra.mxu1 %vm550_vm4, %v1258_v37 }
 0xa28   : > { %v1111_v42 = vpop.f32.mrf.mxu1  ;;  %v3692_v43 = vpop.f32.mrf.mxu0  ;;  %3719 = vmatpush3.bf16.msra.mxu1 %v1358_v38  ;;  %3720 = vmatprep.mubr.msk.bf16.mxu1 %vm4124_vm1, %v4123_v7 }
 0xa29   : > { %3715 = vmatmul.mubr.msk.bf16.vlgmr.msra.gmra.mxu0 %vm550_vm4, %v1259_v0  ;;  %3730 = vmatprep.subr.bf16.mxu1 %v4123_v7 }
 0xa2a   : > { %v3687_v44 = vpop.f32.mrf.mxu1  ;;  %v1159_v45 = vpop.f32.mrf.mxu0  ;;  %3725 = vmatpush3.bf16.msra.mxu0 %v1404_v41  ;;  %3726 = vmatprep.mubr.msk.bf16.mxu0 %vm4124_vm1, %v4123_v7 }
 0xa2b   : > { %3750 = vmatprep.subr.bf16.mxu0 %v4123_v7  ;;  %v3332_v44 = vld [vmem:[%s4953_s2 + $0xd] ss:$0 sm:$0xff] }
 0xa2c   : > { %v3693_v46 = vpop.f32.mrf.mxu0 }
 0xa2d   : > { %v3333_v46 = vld [vmem:[%s4953_s2 + $0xe] ss:$0 sm:$0xff] }
 0xa2e   : > { %v1204_v48 = vpop.f32.mrf.mxu1 }
 0xa2f   : > { %v1260_v49 = vpack.c.bf16 %v1204_v48, %v1204_v48 }
 0xa30   : > { %v3698_v50 = vpop.f32.mrf.mxu1 }
 0xa31   : > { %3721 = vmatmul.mubr.msk.bf16.vlgmr.msra.gmra.mxu1 %vm550_vm4, %v1260_v49 }
 0xa32   : > { %v1207_v51 = vpop.f32.mrf.mxu1  ;;  %3746 = vmatprep.mubr.msk.bf16.mxu1 %vm4124_vm1, %v4123_v7  ;;  %3731 = vmatpush3.bf16.msra.mxu1 %v4003_v58  ;;  %v4019_v58 = vld [vmem:[%s4952_s1 + $0x238] sm:$0xff]  }
 0xa33   : > { %3732 = vmatprep.subr.bf16.mxu1 %v4123_v7  ;;  %v4018_v51 = vld [vmem:[%s4952_s1 + $0x180] sm:$0xff]  }
 0xa34   : > { %v3699_v52 = vpop.f32.mrf.mxu1 }
 0xa35   : > { %v3334_v52 = vld [vmem:[%s4953_s2 + $0x12] ss:$0 sm:$0xff] }
 0xa36   : > { %3733 = vmatpush3.bf16.msra.mxu1 %v4004_v22  ;;  %v4029_v22 = vld [vmem:[%s4952_s1 + $0x1e8] sm:$0xff]  }
 0xa37   : > { %3734 = vmatprep.subr.bf16.mxu1 %v4123_v7 }
 0xa5f   : > { %v1252_v53 = vpop.f32.mrf.mxu0 }
 0xa60   : > { %v1261_v54 = vpack.c.bf16 %v1252_v53, %v1252_v53 }
 0xa61   : > { %v3704_v55 = vpop.f32.mrf.mxu0 }
 0xa62   : > { %3727 = vmatmul.mubr.msk.bf16.vlgmr.msra.gmra.mxu0 %vm550_vm4, %v1261_v54 }
 0xa63   : > { %v1255_v56 = vpop.f32.mrf.mxu0  ;;  %3766 = vmatprep.mubr.msk.bf16.mxu0 %vm4124_vm1, %v4123_v7  ;;  %3751 = vmatpush3.bf16.msra.mxu0 %v4011_v28  ;;  %v4033_v28 = vld [vmem:[%s4952_s1 + $0x1c8] sm:$0xff]  }
 0xa64   : > { %3752 = vmatprep.subr.bf16.mxu0 %v4123_v7 }
 0xa65   : > { %v3705_v57 = vpop.f32.mrf.mxu0 }
 0xa67   : > { %3753 = vmatpush3.bf16.msra.mxu0 %v4012_v29 }
 0xa68   : > { %3754 = vmatprep.subr.bf16.mxu0 %v4123_v7 }
 0xa6b   : > { %3755 = vmatpush3.bf16.msra.mxu0 %v4013_v30  ;;  %v4034_v30 = vld [vmem:[%s4952_s1 + $0x1c0] sm:$0xff]  }
 0xa6c   : > { %3756 = vmatprep.subr.bf16.mxu0 %v4123_v7 }
 0xa6f   : > { %3757 = vmatpush3.bf16.msra.mxu0 %v4014_v31 }
 0xa70   : > { %3758 = vmatprep.subr.bf16.mxu0 %v4123_v7 }
 0xa73   : > { %3759 = vmatpush3.bf16.msra.mxu0 %v4015_v32 }
 0xa74   : > { %3760 = vmatprep.subr.bf16.mxu0 %v4123_v7 }
 0xa77   : > { %3761 = vmatpush3.bf16.msra.mxu0 %v4016_v33 }
 0xa78   : > { %3762 = vmatprep.subr.bf16.mxu0 %v4123_v7 }
 0xa7b   : > { %3763 = vmatpush3.bf16.msra.mxu0 %v4017_v35 }
 0xa7c   : > { %3764 = vmatprep.subr.bf16.mxu0 %v4123_v7 }
 0xa7f   : > { %3765 = vmatpush3.bf16.msra.mxu0 %v4018_v51  ;;  %v3356_v51 = vld [vmem:[%s4953_s2 + $0x17] ss:$0 sm:$0xff] }
 0xa80   : > { %3790 = vmatprep.subr.bf16.mxu0 %v4123_v7 }
 0xae7   : > { %v1302_v59 = vpop.f32.mrf.mxu1 }
 0xae9   : > { %v3710_v60 = vpop.f32.mrf.mxu1  ;;  %v1348_v61 = vpop.f32.mrf.mxu0 }
 0xaea   : > { %v1446_v5 = vadd.f32 %v1348_v61, %v1302_v59  ;;  %v4020_v61 = vld [vmem:[%s4952_s1 + $0x230] sm:$0xff]  }
 0xaeb   : > { %v1305_v62 = vpop.f32.mrf.mxu1  ;;  %v3716_v63 = vpop.f32.mrf.mxu0 }
 0xaec   : > { %v4021_v62 = vld [vmem:[%s4952_s1 + $0x228] sm:$0xff]   ;;  %v4022_v63 = vld [vmem:[%s4952_s1 + $0x220] sm:$0xff]  }
 0xaed   : > { %v3711_v1 = vpop.f32.mrf.mxu1  ;;  %v1351_v2 = vpop.f32.mrf.mxu0 }
 0xaee   : > { %v4023_v1 = vld [vmem:[%s4952_s1 + $0x218] sm:$0xff]   ;;  %v4024_v2 = vld [vmem:[%s4952_s1 + $0x210] sm:$0xff]  }
 0xaef   : > { %v3717_v3 = vpop.f32.mrf.mxu0 }
 0xaf0   : > { %v3354_v3 = vld [vmem:[%s4953_s2 + $0x15] ss:$0 sm:$0xff] }
 0xaf1   : > { %v1394_v4 = vpop.f32.mrf.mxu1 }
 0xaf2   : > { %v1447_v10 = vadd.f32 %v1446_v5, %v1394_v4  ;;  %v4025_v4 = vld [vmem:[%s4952_s1 + $0x208] sm:$0xff]  }
 0xaf3   : > { %v3722_v6 = vpop.f32.mrf.mxu1 }
 0xaf4   : > { %v1739_v6 = vmul.f32 %v3354_v3, %v4265_v47 }
 0xaf5   : > { %v1397_v8 = vpop.f32.mrf.mxu1 }
 0xaf6   : > { %v3355_v8 = vld [vmem:[%s4953_s2 + $0x16] ss:$0 sm:$0xff] }
 0xaf7   : > { %v3723_v9 = vpop.f32.mrf.mxu1  ;;  %v1744_v5 = vadd.f32 %v3355_v8, %v1739_v6 }
 0xaf8   : > { %v4026_v9 = vld [vmem:[%s4952_s1 + $0x200] sm:$0xff]  }
 0xb22   : > { %v1440_v11 = vpop.f32.mrf.mxu0 }
 0xb23   : > { %v1448_v12 = vadd.f32 %v1447_v10, %v1440_v11  ;;  %v1871_v10 = vpack.c.bf16 %v1744_v5, %v1744_v5  ;;  %v3351_v11 = vld [vmem:[%s4953_s2 + $0x11] ss:$0 sm:$0xff]  ;;  %v4035_v5 = vld [vmem:[%s4952_s1 + $0x248] sm:$0xff]  }
 0xb24   : > { %v3728_v15 = vpop.f32.mrf.mxu0 }
 0xb25   : > { %v1449_v14 = vadd.f32 %v1448_v12, %v4309_v34  ;;  %v4005_v34 = vld [vmem:[%s4952_s1 + $0x168] sm:$0xff]  }
 0xb26   : > { %v1443_v16 = vpop.f32.mrf.mxu0  ;;  %3735 = vmatpush3.bf16.msra.mxu1 %v4005_v34  ;;  %v4030_v34 = vld [vmem:[%s4952_s1 + $0x1e0] sm:$0xff]  }
 0xb27   : > { %v4479_v17 = vadd.f32 %v3331_v13, %v1449_v14  ;;  %3736 = vmatprep.subr.bf16.mxu1 %v4123_v7 }
 0xb28   : > { %v3729_v18 = vpop.f32.mrf.mxu0 }
 0xb29   : > { %v1458_v19 = vsel %vm209_vm0, %v4479_v17, 0.0  ;;  %v1462_v20 = vmul.f32 %v4479_v17, %v4479_v17 }
 0xb2a   : > { %1459 = vadd.xlane.f32.xlu0 %v1458_v19  ;;  %3737 = vmatpush3.bf16.msra.mxu1 %v4006_v23  ;;  %v4031_v23 = vld [vmem:[%s4952_s1 + $0x1d8] sm:$0xff]  }
 0xb2b   : > { %v1463_v21 = vsel %vm209_vm0, %v1462_v20, 0.0  ;;  %3738 = vmatprep.subr.bf16.mxu1 %v4123_v7 }
 0xb2c   : > { %1464 = vadd.xlane.f32.xlu1 %v1463_v21  ;;  %v4027_v21 = vld [vmem:[%s4952_s1 + $0x1f8] sm:$0xff]  }
 0xb2e   : > { %3739 = vmatpush3.bf16.msra.mxu1 %v4007_v24 }
 0xb2f   : > { %3740 = vmatprep.subr.bf16.mxu1 %v4123_v7 }
 0xb32   : > { %3741 = vmatpush3.bf16.msra.mxu1 %v4008_v25  ;;  %v4032_v25 = vld [vmem:[%s4952_s1 + $0x1d0] sm:$0xff]  }
 0xb33   : > { %3742 = vmatprep.subr.bf16.mxu1 %v4123_v7 }
 0xb36   : > { %3743 = vmatpush3.bf16.msra.mxu1 %v4009_v26 }
 0xb37   : > { %3744 = vmatprep.subr.bf16.mxu1 %v4123_v7 }
 0xb3a   : > { %3745 = vmatpush3.bf16.msra.mxu1 %v4010_v27 }
 0xb3b   : > { %3770 = vmatprep.subr.bf16.mxu1 %v4123_v7 }
 0xbb3   : > { %v1460_v36 = vpop.xlane.xlu0 %1459 }
 0xbb4   : > { %v1461_v37 = vmul.f32 0.03125, %v1460_v36 }
 0xbb5   : > { %v1465_v38 = vpop.xlane.xlu1 %1464 }
 0xbb6   : > { %v1467_v39 = vmul.f32 %v1461_v37, %v1461_v37  ;;  %v1466_v40 = vmul.f32 0.03125, %v1465_v38  ;;  %v1469_v42 = vsub.f32 %v4479_v17, %v1461_v37 }
 0xbb8   : > { %v1468_v0 = vsub.f32 %v1466_v40, %v1467_v39  ;;  %v3365_v39 = vld [vmem:[%s4953_s2 + $0x19] ss:$0 sm:$0xff] }
 0xbba   : > { %v1470_v41 = vadd.f32 1e-05, %v1468_v0 }
 0xbbc   : > { %4087 = vrsqrt.f32 %v1470_v41  ;;  %v3352_v41 = vld [vmem:[%s4953_s2 + $0x13] ss:$0 sm:$0xff] }
 0xbc9   : > { %v4088_v43 = vpop.eup %4087 }
 0xbca   : > { %v1472_v45 = vmul.f32 %v4088_v43, %v1469_v42 }
 0xbcc   : > { %v1477_v48 = vmul.f32 %v3332_v44, %v1472_v45  ;;  %v3353_v44 = vld [vmem:[%s4953_s2 + $0x14] ss:$0 sm:$0xff] }
 0xbce   : > { %v1482_v49 = vadd.f32 %v3333_v46, %v1477_v48 }
 0xbd0   : > { %v1499_v50 = vpack.c.bf16 %v1482_v49, %v1482_v49 }
 0xbd2   : > { %3747 = vmatmul.mubr.bf16.vlgmr.msra.gmra.mxu1 %v1499_v50 }
 0xbd3   : > { %3786 = vmatprep.mubr.msk.bf16.mxu1 %vm4124_vm1, %v4123_v7  ;;  %3771 = vmatpush3.bf16.msra.mxu1 %v4027_v21 }
 0xbd4   : > { %3772 = vmatprep.subr.bf16.mxu1 %v4123_v7 }
 0xc92   : > { %v1587_v53 = vpop.f32.mrf.mxu1 }
 0xc93   : > { %v1588_v54 = vadd.f32 %v3334_v52, %v1587_v53 }
 0xc94   : > { %v3748_v55 = vpop.f32.mrf.mxu1 }
 0xc95   : > { %v1593_v56 = vmax.f32 %v1588_v54, 0.0 }
 0xc96   : > { %v1590_v57 = vpop.f32.mrf.mxu1 }
 0xc97   : > { %v1610_v59 = vpack.c.bf16 %v1593_v56, %v1593_v56 }
 0xc98   : > { %v3749_v60 = vpop.f32.mrf.mxu1 }
 0xc99   : > { %3767 = vmatmul.mubr.bf16.vlgmr.msra.gmra.mxu0 %v1610_v59 }
 0xc9a   : > { %3791 = vmatpush3.bf16.msra.mxu0 %v4019_v58  ;;  %3806 = vmatprep.mubr.msk.bf16.mxu0 %vm4124_vm1, %v4123_v7 }
 0xc9b   : > { %3792 = vmatprep.subr.bf16.mxu0 %v4123_v7 }
 0xc9e   : > { %3793 = vmatpush3.bf16.msra.mxu0 %v4020_v61 }
 0xc9f   : > { %3794 = vmatprep.subr.bf16.mxu0 %v4123_v7 }
 0xca2   : > { %3795 = vmatpush3.bf16.msra.mxu0 %v4021_v62 }
 0xca3   : > { %3796 = vmatprep.subr.bf16.mxu0 %v4123_v7 }
 0xca6   : > { %3797 = vmatpush3.bf16.msra.mxu0 %v4022_v63 }
 0xca7   : > { %3798 = vmatprep.subr.bf16.mxu0 %v4123_v7 }
 0xcaa   : > { %3799 = vmatpush3.bf16.msra.mxu0 %v4023_v1 }
 0xcab   : > { %3800 = vmatprep.subr.bf16.mxu0 %v4123_v7 }
 0xcae   : > { %3801 = vmatpush3.bf16.msra.mxu0 %v4024_v2 }
 0xcaf   : > { %3802 = vmatprep.subr.bf16.mxu0 %v4123_v7 }
 0xcb2   : > { %3803 = vmatpush3.bf16.msra.mxu0 %v4025_v4 }
 0xcb3   : > { %3804 = vmatprep.subr.bf16.mxu0 %v4123_v7 }
 0xcb6   : > { %3805 = vmatpush3.bf16.msra.mxu0 %v4026_v9 }
 0xcb7   : > { %3816 = vmatprep.subr.bf16.mxu0 %v4123_v7 }
 0xcb9   : > { %3807 = vmatmul.mubr.bf16.vlgmr.msra.gmra.mxu0 %v1871_v10 }
 0xcba   : > { %3818 = vmatprep.mubr.msk.bf16.mxu0 %vm4124_vm1, %v4123_v7 }
 0xd59   : > { %v1693_v47 = vpop.f32.mrf.mxu0 }
 0xd5a   : > { %v1699_v12 = vadd.f32 %v1693_v47, %v4479_v17  ;;  %v4028_v17 = vld [vmem:[%s4952_s1 + $0x1f0] sm:$0xff]  }
 0xd5b   : > { %v3768_v13 = vpop.f32.mrf.mxu0  ;;  %3773 = vmatpush3.bf16.msra.mxu1 %v4028_v17 }
 0xd5c   : > { %v4605_v15 = vadd.f32 %v3351_v11, %v1699_v12  ;;  %3774 = vmatprep.subr.bf16.mxu1 %v4123_v7 }
 0xd5d   : > { %v1696_v14 = vpop.f32.mrf.mxu0 }
 0xd5e   : > { %v1708_v16 = vsel %vm209_vm0, %v4605_v15, 0.0  ;;  %v1712_v18 = vmul.f32 %v4605_v15, %v4605_v15  ;;  %v4036_v14 = vld [vmem:[%s4952_s1 + $0x240] sm:$0xff]  }
 0xd5f   : > { %1709 = vadd.xlane.f32.xlu0 %v1708_v16  ;;  %v3769_v19 = vpop.f32.mrf.mxu0  ;;  %3775 = vmatpush3.bf16.msra.mxu1 %v4029_v22  ;;  %v3379_v22 = vld [vmem:[%s4953_s2 + $0x18] ss:$0 sm:$0xff] }
 0xd60   : > { %v1713_v20 = vsel %vm209_vm0, %v1712_v18, 0.0  ;;  %3776 = vmatprep.subr.bf16.mxu1 %v4123_v7 }
 0xd63   : > { %1714 = vadd.xlane.f32.xlu0 %v1713_v20  ;;  %3777 = vmatpush3.bf16.msra.mxu1 %v4030_v34 }
 0xd64   : > { %3778 = vmatprep.subr.bf16.mxu1 %v4123_v7 }
 0xd67   : > { %3779 = vmatpush3.bf16.msra.mxu1 %v4031_v23 }
 0xd68   : > { %3780 = vmatprep.subr.bf16.mxu1 %v4123_v7 }
 0xd6b   : > { %3781 = vmatpush3.bf16.msra.mxu1 %v4032_v25 }
 0xd6c   : > { %3782 = vmatprep.subr.bf16.mxu1 %v4123_v7 }
 0xd6f   : > { %3783 = vmatpush3.bf16.msra.mxu1 %v4033_v28 }
 0xd70   : > { %3784 = vmatprep.subr.bf16.mxu1 %v4123_v7 }
 0xd73   : > { %3785 = vmatpush3.bf16.msra.mxu1 %v4034_v30  ;;  %v4037_v30 = vld [vmem:[%s4952_s1 + $0x2b8] sm:$0xff]  }
 0xd74   : > { %3810 = vmatprep.subr.bf16.mxu1 %v4123_v7 }
 0xd79   : > { %v1959_v24 = vpop.f32.mrf.mxu0 }
 0xd7a   : > { %v1960_v42 = vadd.f32 %v3365_v39, %v1959_v24 }
 0xd7b   : > { %v3808_v26 = vpop.f32.mrf.mxu0 }
 0xd7c   : > { %v1970_v46 = vpack.c.bf16 %v1960_v42, %v1960_v42 }
 0xd7d   : > { %v1962_v27 = vpop.f32.mrf.mxu0 }
 0xd7e   : > { %v1975_v50 = vsel %vm486_vm2, %v1970_v46, 0 }
 0xd7f   : > { %v3809_v29 = vpop.f32.mrf.mxu0 }
 0xde8   : > { %v1710_v31 = vpop.xlane.xlu0 %1709 }
 0xde9   : > { %v1711_v32 = vmul.f32 0.03125, %v1710_v31  ;;  %v4039_v31 = vld [vmem:[%s4952_s1 + $0x2a8] sm:$0xff]  }
 0xdeb   : > { %v1717_v35 = vmul.f32 %v1711_v32, %v1711_v32  ;;  %v1719_v40 = vsub.f32 %v4605_v15, %v1711_v32  ;;  %v4040_v32 = vld [vmem:[%s4952_s1 + $0x2a0] sm:$0xff]  }
 0xdec   : > { %v1715_v33 = vpop.xlane.xlu0 %1714 }
 0xded   : > { %v1716_v36 = vmul.f32 0.03125, %v1715_v33  ;;  %v4041_v33 = vld [vmem:[%s4952_s1 + $0x298] sm:$0xff]  }
 0xdef   : > { %v1718_v37 = vsub.f32 %v1716_v36, %v1717_v35  ;;  %v4042_v35 = vld [vmem:[%s4952_s1 + $0x290] sm:$0xff]   ;;  %v4043_v36 = vld [vmem:[%s4952_s1 + $0x288] sm:$0xff]  }
 0xdf1   : > { %v1720_v38 = vadd.f32 1e-05, %v1718_v37  ;;  %v4044_v37 = vld [vmem:[%s4952_s1 + $0x280] sm:$0xff]  }
 0xdf3   : > { %4089 = vrsqrt.f32 %v1720_v38 }
 0xe00   : > { %v4090_v0 = vpop.eup %4089 }
 0xe01   : > { %v1722_v43 = vmul.f32 %v4090_v0, %v1719_v40 }
 0xe03   : > { %v1727_v45 = vmul.f32 %v3352_v41, %v1722_v43 }
 0xe05   : > { %v1732_v48 = vadd.f32 %v3353_v44, %v1727_v45 }
 0xe07   : > { %v1761_v49 = vpack.c.bf16 %v1732_v48, %v1732_v48 }
 0xe09   : > { %3787 = vmatmul.mubr.bf16.vlgmr.msra.gmra.mxu1 %v1761_v49  ;;  %v3381_v49 = vld [vmem:[%s4953_s2 + $0x1b] ss:$0 sm:$0xff] }
 0xe0a   : > { %3811 = vmatpush3.bf16.xpose.msra.mxu1 %v1975_v50  ;;  %3812 = vmatprep.mubr.msk.bf16.mxu1 %vm4124_vm1, %v4123_v7 }
 0xe0b   : > { %3822 = vmatprep.subr.bf16.mxu1 %v4123_v7 }
 0xec9   : > { %v1849_v52 = vpop.f32.mrf.mxu1 }
 0xeca   : > { %v1850_v53 = vadd.f32 %v3356_v51, %v1849_v52 }
 0xecb   : > { %v3788_v54 = vpop.f32.mrf.mxu1 }
 0xecc   : > { %v1969_v55 = vpack.c.bf16 %v1850_v53, %v1850_v53  ;;  %v3382_v53 = vld [vmem:[%s4953_s2 + $0x1e] ss:$0 sm:$0xff] }
 0xecd   : > { %v1852_v56 = vpop.f32.mrf.mxu1 }
 0xece   : > { %3813 = vmatmul.mubr.msk.bf16.vlgmr.msra.gmra.mxu1 %vm486_vm2, %v1969_v55 }
 0xecf   : > { %v3789_v57 = vpop.f32.mrf.mxu1  ;;  %3826 = vmatprep.mubr.msk.bf16.mxu1 %vm4124_vm1, %v4123_v7  ;;  %3823 = vmatpush3.bf16.msra.mxu1 %v4035_v5 }
 0xed0   : > { %3824 = vmatprep.subr.bf16.mxu1 %v4123_v7 }
 0xed3   : > { %3825 = vmatpush3.bf16.msra.mxu1 %v4036_v14 }
 0xed4   : > { %3850 = vmatprep.subr.bf16.mxu1 %v4123_v7 }
 0xf8e   : > { %v2011_v58 = vpop.f32.mrf.mxu1 }
 0xf8f   : > { %v2017_v59 = vmul.f32 0.17677669, %v2011_v58 }
 0xf90   : > { %v3814_v60 = vpop.f32.mrf.mxu1 }
 0xf91   : > { %v2018_v61 = vsel %vm534_vm3, %v2017_v59, -inf }
 0xf92   : > { %2019 = vmax.xlane.f32.xlu0 %v2018_v61  ;;  %v2014_v62 = vpop.f32.mrf.mxu1 }
 0xf94   : > { %v3815_v63 = vpop.f32.mrf.mxu1 }
 0xfa8   : > { %2031 = vrot.lane.b32.xlu0 %v1970_v46, %s4125_s19  ;;  %v3380_v46 = vld [vmem:[%s4953_s2 + $0x1a] ss:$0 sm:$0xff] }
0x101b   : > { %v2020_v1 = vpop.xlane.xlu0 %2019 }
0x101c   : > { %v2021_v2 = vsub.f32 %v2017_v59, %v2020_v1 }
0x101e   : > { %v2022_v3 = vmul.f32 1.442695, %v2021_v2 }
0x101f   : > { %v2032_v4 = vpop.permute.xlu0 %2031 }
0x1020   : > { %4091 = vpow2.f32 %v2022_v3  ;;  %v2037_v6 = vsel %vm209_vm0, %v2032_v4, 0 }
0x1021   : > { %3817 = vmatpush3.bf16.msra.mxu0 %v2037_v6 }
0x1022   : > { %3830 = vmatprep.subr.bf16.mxu0 %v4123_v7 }
0x102d   : > { %v4092_v8 = vpop.eup %4091 }
0x102e   : > { %v2024_v9 = vsel %vm534_vm3, %v4092_v8, 0.0 }
0x102f   : > { %2025 = vadd.xlane.f32.xlu1 %v2024_v9 }
0x10b8   : > { %v2026_v10 = vpop.xlane.xlu1 %2025 }
0x10b9   : > { %4093 = vrcp.f32 %v2026_v10 }
0x10c6   : > { %v4094_v47 = vpop.eup %4093 }
0x10c7   : > { %v2028_v11 = vmul.f32 %v4094_v47, %v4092_v8 }
0x10c9   : > { %v2029_v12 = vpack.c.bf16 %v2028_v11, %v2028_v11  ;;  %v2142_v13 = vsel %vm550_vm4, %v2028_v11, 0.0 }
0x10ca   : > { %2143 = vst [vmem:[%s203_s7] sm:$0xf] %v2142_v13 }
0x10cb   : > { %3819 = vmatmul.mubr.msk.bf16.vlgmr.msra.gmra.mxu0 %vm550_vm4, %v2029_v12 }
0x10cc   : > { %3846 = vmatprep.mubr.msk.bf16.mxu0 %vm4124_vm1, %v4123_v7  ;;  %3831 = vmatpush3.bf16.msra.mxu0 %v4037_v30 }
0x10cd   : > { %3832 = vmatprep.subr.bf16.mxu0 %v4123_v7 }
0x118b   : > { %v2073_v16 = vpop.f32.mrf.mxu0 }
0x118c   : > { %v2079_v18 = vpack.c.bf16 %v2073_v16, %v2073_v16 }
0x118d   : > { %v3820_v19 = vpop.f32.mrf.mxu0 }
0x118e   : > { %3827 = vmatmul.mubr.msk.bf16.vlgmr.msra.gmra.mxu1 %vm486_vm2, %v2079_v18 }
0x118f   : > { %v2076_v20 = vpop.f32.mrf.mxu0  ;;  %3852 = vmatprep.mubr.msk.bf16.mxu1 %vm4124_vm1, %v4123_v7 }
0x1191   : > { %v3821_v21 = vpop.f32.mrf.mxu0 }
0x124e   : > { %v2129_v17 = vpop.f32.mrf.mxu1 }
0x124f   : > { %v2135_v34 = vadd.f32 %v2129_v17, %v4605_v15  ;;  %v4038_v15 = vld [vmem:[%s4952_s1 + $0x2b0] sm:$0xff]  }
0x1250   : > { %v3828_v23 = vpop.f32.mrf.mxu1  ;;  %3833 = vmatpush3.bf16.msra.mxu0 %v4038_v15 }
0x1251   : > { %v4694_v24 = vadd.f32 %v3379_v22, %v2135_v34  ;;  %3834 = vmatprep.subr.bf16.mxu0 %v4123_v7 }
0x1252   : > { %v2132_v25 = vpop.f32.mrf.mxu1 }
0x1253   : > { %v2146_v26 = vsel %vm209_vm0, %v4694_v24, 0.0  ;;  %v2150_v27 = vmul.f32 %v4694_v24, %v4694_v24 }
0x1254   : > { %2147 = vadd.xlane.f32.xlu1 %v2146_v26  ;;  %v3829_v28 = vpop.f32.mrf.mxu1  ;;  %3835 = vmatpush3.bf16.msra.mxu0 %v4039_v31 }
0x1255   : > { %v2151_v29 = vsel %vm209_vm0, %v2150_v27, 0.0  ;;  %3836 = vmatprep.subr.bf16.mxu0 %v4123_v7 }
0x1258   : > { %2152 = vadd.xlane.f32.xlu1 %v2151_v29  ;;  %3837 = vmatpush3.bf16.msra.mxu0 %v4040_v32 }
0x1259   : > { %3838 = vmatprep.subr.bf16.mxu0 %v4123_v7 }
0x125c   : > { %3839 = vmatpush3.bf16.msra.mxu0 %v4041_v33 }
0x125d   : > { %3840 = vmatprep.subr.bf16.mxu0 %v4123_v7 }
0x1260   : > { %3841 = vmatpush3.bf16.msra.mxu0 %v4042_v35 }
0x1261   : > { %3842 = vmatprep.subr.bf16.mxu0 %v4123_v7 }
0x1264   : > { %3843 = vmatpush3.bf16.msra.mxu0 %v4043_v36 }
0x1265   : > { %3844 = vmatprep.subr.bf16.mxu0 %v4123_v7 }
0x1268   : > { %3845 = vmatpush3.bf16.msra.mxu0 %v4044_v37 }
0x1269   : > { %3874 = vmatprep.subr.bf16.mxu0 %v4123_v7 }
0x12dd   : > { %v2148_v38 = vpop.xlane.xlu1 %2147 }
0x12de   : > { %v2149_v39 = vmul.f32 0.03125, %v2148_v38 }
0x12e0   : > { %v2155_v0 = vmul.f32 %v2149_v39, %v2149_v39  ;;  %v2157_v44 = vsub.f32 %v4694_v24, %v2149_v39 }
0x12e1   : > { %v2153_v40 = vpop.xlane.xlu1 %2152 }
0x12e2   : > { %v2154_v41 = vmul.f32 0.03125, %v2153_v40 }
0x12e4   : > { %v2156_v42 = vsub.f32 %v2154_v41, %v2155_v0 }
0x12e6   : > { %v2158_v43 = vadd.f32 1e-05, %v2156_v42 }
0x12e8   : > { %4095 = vrsqrt.f32 %v2158_v43 }
0x12f5   : > { %v4096_v45 = vpop.eup %4095 }
0x12f6   : > { %v2160_v48 = vmul.f32 %v4096_v45, %v2157_v44 }
0x12f8   : > { %v2165_v50 = vmul.f32 %v3380_v46, %v2160_v48 }
0x12fa   : > { %v2170_v51 = vadd.f32 %v3381_v49, %v2165_v50 }
0x12fc   : > { %v2187_v52 = vpack.c.bf16 %v2170_v51, %v2170_v51 }
0x12fe   : > { %3847 = vmatmul.mubr.bf16.vlgmr.msra.gmra.mxu0 %v2187_v52 }
0x12ff   : > { %3876 = vmatprep.mubr.msk.bf16.mxu0 %vm4124_vm1, %v4123_v7 }
0x13be   : > { %v2275_v54 = vpop.f32.mrf.mxu0 }
0x13bf   : > { %v2276_v55 = vadd.f32 %v3382_v53, %v2275_v54 }
0x13c0   : > { %v3848_v56 = vpop.f32.mrf.mxu0 }
0x13c1   : > { %2289 = vrot.lane.b32.xlu0 %v2276_v55, %s4126_s25  ;;  %2286 = vrot.lane.b32.xlu1 %v2276_v55, %s4127_s26  ;;  %v4747_v58 = vpack.c.bf16 %v2276_v55, %v2276_v55 }
0x13c2   : > { %v2278_v57 = vpop.f32.mrf.mxu0 }
0x13c4   : > { %v3849_v59 = vpop.f32.mrf.mxu0 }
0x13c5   : > { %2292 = vrot.lane.b32.xlu1 %v2276_v55, %s4128_s27  ;;  %2300 = vrot.lane.b32.xlu0 %v4747_v58, %s4125_s19 }
0x1433   : > { %v2290_v60 = vpop.permute.xlu0 %2289  ;;  %v2287_v61 = vpop.permute.xlu1 %2286 }
0x1434   : > { %v4752_v62 = vpack.c.bf16 %v2290_v60, %v2290_v60  ;;  %v4754_v63 = vpack.c.bf16 %v2287_v61, %v2287_v61 }
0x1436   : > { %2349 = vrot.lane.b32.xlu1 %v4754_v63, %s4125_s19  ;;  %2398 = vrot.lane.b32.xlu0 %v4752_v62, %s4125_s19 }
0x1437   : > { %v2293_v1 = vpop.permute.xlu1 %2292  ;;  %v2301_v2 = vpop.permute.xlu0 %2300 }
0x1438   : > { %v4760_v3 = vpack.c.bf16 %v2293_v1, %v2293_v1  ;;  %v2306_v4 = vsel %vm550_vm4, %v2301_v2, 0 }
0x1439   : > { %3851 = vmatpush3.bf16.xpose.msra.mxu1 %v2306_v4 }
0x143a   : > { %2447 = vrot.lane.b32.xlu1 %v4760_v3, %s4125_s19  ;;  %3856 = vmatprep.subr.bf16.mxu1 %v4123_v7 }
0x1440   : > { %3853 = vmatmul.mubr.msk.bf16.vlgmr.msra.gmra.mxu1 %vm550_vm4, %v4747_v58 }
0x1441   : > { %3858 = vmatprep.mubr.msk.bf16.mxu1 %vm4124_vm1, %v4123_v7 }
0x14a8   : > { %v2350_v6 = vpop.permute.xlu1 %2349  ;;  %v2399_v9 = vpop.permute.xlu0 %2398 }
0x14a9   : > { %v2355_v8 = vsel %vm550_vm4, %v2350_v6, 0  ;;  %v2404_v5 = vsel %vm550_vm4, %v2399_v9, 0 }
0x14aa   : > { %3857 = vmatpush3.bf16.xpose.msra.mxu1 %v2355_v8 }
0x14ab   : > { %3862 = vmatprep.subr.bf16.mxu1 %v4123_v7 }
0x14ac   : > { %v2448_v10 = vpop.permute.xlu1 %2447 }
0x14ad   : > { %v2453_v47 = vsel %vm550_vm4, %v2448_v10, 0 }
0x14b1   : > { %3859 = vmatmul.mubr.msk.bf16.vlgmr.msra.gmra.mxu1 %vm550_vm4, %v4754_v63 }
0x14b2   : > { %3863 = vmatpush3.bf16.xpose.msra.mxu1 %v2404_v5  ;;  %3864 = vmatprep.mubr.msk.bf16.mxu1 %vm4124_vm1, %v4123_v7 }
0x14b3   : > { %3868 = vmatprep.subr.bf16.mxu1 %v4123_v7 }
0x14b9   : > { %3865 = vmatmul.mubr.msk.bf16.vlgmr.msra.gmra.mxu1 %vm550_vm4, %v4752_v62 }
0x14ba   : > { %3869 = vmatpush3.bf16.xpose.msra.mxu1 %v2453_v47  ;;  %3870 = vmatprep.mubr.msk.bf16.mxu1 %vm4124_vm1, %v4123_v7 }
0x14bb   : > { %3880 = vmatprep.subr.bf16.mxu1 %v4123_v7 }
0x14c1   : > { %3871 = vmatmul.mubr.msk.bf16.vlgmr.msra.gmra.mxu1 %vm550_vm4, %v4760_v3 }
0x14c2   : > { %3882 = vmatprep.mubr.msk.bf16.mxu1 %vm4124_vm1, %v4123_v7 }
0x1500   : > { %v2342_v11 = vpop.f32.mrf.mxu1 }
0x1501   : > { %v2495_v12 = vmul.f32 0.35355338, %v2342_v11 }
0x1502   : > { %v3854_v13 = vpop.f32.mrf.mxu1 }
0x1503   : > { %v2499_v14 = vsel %vm1015_vm5, %v2495_v12, -inf }
0x1504   : > { %2500 = vmax.xlane.f32.xlu0 %v2499_v14  ;;  %v2345_v16 = vpop.f32.mrf.mxu1 }
0x1506   : > { %v3855_v18 = vpop.f32.mrf.mxu1 }
0x1571   : > { %v2391_v19 = vpop.f32.mrf.mxu1 }
0x1572   : > { %v2496_v20 = vmul.f32 0.35355338, %v2391_v19  ;;  %v2281_v19 = vld [vmem:[%s4952_s1 + $0x2c0] sm:$0xf] }
0x1573   : > { %v3860_v21 = vpop.f32.mrf.mxu1 }
0x1574   : > { %v2502_v17 = vsel %vm1015_vm5, %v2496_v20, -inf  ;;  %v2282_v21 = vld [vmem:[%s4952_s1 + $0x2c4] sm:$0xf] }
0x1575   : > { %2503 = vmax.xlane.f32.xlu1 %v2502_v17  ;;  %v2394_v22 = vpop.f32.mrf.mxu1  ;;  %v2793_v17 = vsel %vm209_vm0, %v2282_v21, 0  ;;  %v4057_v21 = vld [vmem:[%s4952_s1 + $0x358] sm:$0xff]  }
0x1576   : > { %v2283_v22 = vld [vmem:[%s4952_s1 + $0x2c8] sm:$0xf] }
0x1577   : > { %v3861_v34 = vpop.f32.mrf.mxu1 }
0x1579   : > { %v2440_v23 = vpop.f32.mrf.mxu1 }
0x157a   : > { %v2497_v25 = vmul.f32 0.35355338, %v2440_v23  ;;  %v2284_v23 = vld [vmem:[%s4952_s1 + $0x2cc] sm:$0xf] }
0x157b   : > { %v3866_v26 = vpop.f32.mrf.mxu1 }
0x157c   : > { %v2505_v27 = vsel %vm1015_vm5, %v2497_v25, -inf  ;;  %v2839_v26 = vsel %vm209_vm0, %v2283_v22, 0 }
0x157d   : > { %2506 = vmax.xlane.f32.xlu0 %v2505_v27  ;;  %v2443_v28 = vpop.f32.mrf.mxu1 }
0x157f   : > { %v3867_v29 = vpop.f32.mrf.mxu1 }
0x1581   : > { %v2489_v30 = vpop.f32.mrf.mxu1 }
0x1582   : > { %v2498_v15 = vmul.f32 0.35355338, %v2489_v30  ;;  %v2885_v30 = vsel %vm209_vm0, %v2284_v23, 0 }
0x1583   : > { %v3872_v31 = vpop.f32.mrf.mxu1 }
0x1584   : > { %v2508_v32 = vsel %vm1015_vm5, %v2498_v15, -inf }
0x1585   : > { %2509 = vmax.xlane.f32.xlu0 %v2508_v32  ;;  %v2492_v33 = vpop.f32.mrf.mxu1 }
0x1587   : > { %v3873_v35 = vpop.f32.mrf.mxu1 }
0x158d   : > { %v2501_v36 = vpop.xlane.xlu0 %2500 }
0x158e   : > { %v2511_v37 = vsub.f32 %v2495_v12, %v2501_v36 }
0x1590   : > { %v2515_v38 = vmul.f32 1.442695, %v2511_v37 }
0x1592   : > { %4097 = vpow2.f32 %v2515_v38 }
0x159f   : > { %v4098_v39 = vpop.eup %4097 }
0x15a0   : > { %v2523_v40 = vsel %vm1015_vm5, %v4098_v39, 0.0 }
0x15a1   : > { %2524 = vadd.xlane.f32.xlu0 %v2523_v40 }
0x15fe   : > { %v2504_v0 = vpop.xlane.xlu1 %2503 }
0x15ff   : > { %v2512_v41 = vsub.f32 %v2496_v20, %v2504_v0  ;;  %v2747_v20 = vsel %vm209_vm0, %v2281_v19, 0  ;;  %v4055_v19 = vld [vmem:[%s4952_s1 + $0x368] sm:$0xff]  }
0x1601   : > { %v2517_v42 = vmul.f32 1.442695, %v2512_v41 }
0x1603   : > { %4099 = vpow2.f32 %v2517_v42 }
0x1606   : > { %v2507_v43 = vpop.xlane.xlu0 %2506 }
0x1607   : > { %v2513_v44 = vsub.f32 %v2497_v25, %v2507_v43 }
0x1609   : > { %v2519_v45 = vmul.f32 1.442695, %v2513_v44 }
0x160b   : > { %4101 = vpow2.f32 %v2519_v45  ;;  %v4045_v45 = vld [vmem:[%s4952_s1 + $0x338] sm:$0xff]  }
0x160e   : > { %v2510_v51 = vpop.xlane.xlu0 %2509 }
0x160f   : > { %v2514_v52 = vsub.f32 %v2498_v15, %v2510_v51 }
0x1610   : > { %v4100_v46 = vpop.eup %4099 }
0x1611   : > { %v2526_v48 = vsel %vm1015_vm5, %v4100_v46, 0.0  ;;  %v2521_v53 = vmul.f32 1.442695, %v2514_v52 }
0x1612   : > { %2527 = vadd.xlane.f32.xlu1 %v2526_v48 }
0x1613   : > { %4103 = vpow2.f32 %v2521_v53 }
0x1618   : > { %v4102_v49 = vpop.eup %4101 }
0x1619   : > { %v2529_v50 = vsel %vm1015_vm5, %v4102_v49, 0.0 }
0x161a   : > { %2530 = vadd.xlane.f32.xlu0 %v2529_v50 }
0x1620   : > { %v4104_v54 = vpop.eup %4103 }
0x1621   : > { %v2532_v55 = vsel %vm1015_vm5, %v4104_v54, 0.0 }
0x1623   : > { %2595 = vrot.lane.b32.xlu1 %v4754_v63, %s4129_s28 }
0x1627   : > { %2643 = vrot.lane.b32.xlu1 %v4752_v62, %s4129_s28 }
0x162a   : > { %v2525_v56 = vpop.xlane.xlu0 %2524 }
0x162b   : > { %4105 = vrcp.f32 %v2525_v56 }
0x1630   : > { %2547 = vrot.lane.b32.xlu0 %v4747_v58, %s4129_s28 }
0x1638   : > { %v4106_v58 = vpop.eup %4105 }
0x1639   : > { %v2539_v62 = vmul.f32 %v4106_v58, %v4098_v39 }
0x164b   : > { %2533 = vadd.xlane.f32.xlu1 %v2532_v55 }
0x165c   : > { %2691 = vrot.lane.b32.xlu1 %v4760_v3, %s4129_s28  ;;  %v2543_v3 = vpack.c.bf16 %v2539_v62, %v2539_v62 }
0x169b   : > { %v2528_v57 = vpop.xlane.xlu1 %2527 }
0x169c   : > { %4107 = vrcp.f32 %v2528_v57 }
0x169f   : > { %v2596_v59 = vpop.permute.xlu1 %2595 }
0x16a0   : > { %v2601_v60 = vsel %vm1070_vm6, %v2596_v59, 0 }
0x16a1   : > { %3881 = vmatpush3.bf16.msra.mxu1 %v2601_v60 }
0x16a2   : > { %3892 = vmatprep.subr.bf16.mxu1 %v4123_v7 }
0x16a3   : > { %v2531_v61 = vpop.xlane.xlu0 %2530  ;;  %v2644_v4 = vpop.permute.xlu1 %2643 }
0x16a4   : > { %4109 = vrcp.f32 %v2531_v61  ;;  %v2649_v8 = vsel %vm1070_vm6, %v2644_v4, 0 }
0x16a7   : > { %v2548_v63 = vpop.permute.xlu0 %2547 }
0x16a8   : > { %v2553_v1 = vsel %vm1070_vm6, %v2548_v63, 0  ;;  %v3403_v63 = vld [vmem:[%s4953_s2 + $0x1f] ss:$0 sm:$0xff] }
0x16a9   : > { %v4108_v2 = vpop.eup %4107  ;;  %3875 = vmatpush3.bf16.msra.mxu0 %v2553_v1 }
0x16aa   : > { %3886 = vmatprep.subr.bf16.mxu0 %v4123_v7  ;;  %v2540_v6 = vmul.f32 %v4108_v2, %v4100_v46 }
0x16ac   : > { %3877 = vmatmul.mubr.msk.bf16.vlgmr.msra.gmra.mxu0 %vm1066_vm7, %v2543_v3  ;;  %v2544_v9 = vpack.c.bf16 %v2540_v6, %v2540_v6 }
0x16ad   : > { %3887 = vmatpush3.bf16.msra.mxu0 %v2649_v8  ;;  %3888 = vmatprep.mubr.msk.bf16.mxu0 %vm4124_vm1, %v4123_v7 }
0x16ae   : > { %3883 = vmatmul.mubr.msk.bf16.vlgmr.msra.gmra.mxu1 %vm1066_vm7, %v2544_v9  ;;  %3898 = vmatprep.subr.bf16.mxu0 %v4123_v7 }
0x16af   : > { %3894 = vmatprep.mubr.msk.bf16.mxu1 %vm4124_vm1, %v4123_v7 }
0x16b1   : > { %v4110_v5 = vpop.eup %4109 }
0x16b2   : > { %v2541_v10 = vmul.f32 %v4110_v5, %v4102_v49 }
0x16b4   : > { %v2545_v47 = vpack.c.bf16 %v2541_v10, %v2541_v10  ;;  %v4046_v10 = vld [vmem:[%s4952_s1 + $0x330] sm:$0xff]  }
0x16b6   : > { %3889 = vmatmul.mubr.msk.bf16.vlgmr.msra.gmra.mxu0 %vm1066_vm7, %v2545_v47  ;;  %v4048_v47 = vld [vmem:[%s4952_s1 + $0x320] sm:$0xff]  }
0x16b7   : > { %3900 = vmatprep.mubr.msk.bf16.mxu0 %vm4124_vm1, %v4123_v7  ;;  %3899 = vmatpush3.bf16.msra.mxu0 %v2747_v20  ;;  %v4056_v20 = vld [vmem:[%s4952_s1 + $0x360] sm:$0xff]  }
0x16b8   : > { %3910 = vmatprep.subr.bf16.mxu0 %v4123_v7 }
0x16d4   : > { %v2534_v11 = vpop.xlane.xlu1 %2533 }
0x16d5   : > { %4111 = vrcp.f32 %v2534_v11  ;;  %v4049_v11 = vld [vmem:[%s4952_s1 + $0x318] sm:$0xff]  }
0x16d8   : > { %v2692_v12 = vpop.permute.xlu1 %2691 }
0x16d9   : > { %v2697_v13 = vsel %vm1070_vm6, %v2692_v12, 0  ;;  %v4050_v12 = vld [vmem:[%s4952_s1 + $0x310] sm:$0xff]  }
0x16da   : > { %3893 = vmatpush3.bf16.msra.mxu1 %v2697_v13  ;;  %v4051_v13 = vld [vmem:[%s4952_s1 + $0x308] sm:$0xff]  }
0x16db   : > { %3904 = vmatprep.subr.bf16.mxu1 %v4123_v7 }
0x16e2   : > { %v4112_v14 = vpop.eup %4111 }
0x16e3   : > { %v2542_v16 = vmul.f32 %v4112_v14, %v4104_v54  ;;  %v4052_v14 = vld [vmem:[%s4952_s1 + $0x300] sm:$0xff]  }
0x16e5   : > { %v2546_v18 = vpack.c.bf16 %v2542_v16, %v2542_v16  ;;  %v4053_v16 = vld [vmem:[%s4952_s1 + $0x378] sm:$0xff]  }
0x16e7   : > { %3895 = vmatmul.mubr.msk.bf16.vlgmr.msra.gmra.mxu1 %vm1066_vm7, %v2546_v18  ;;  %v4054_v18 = vld [vmem:[%s4952_s1 + $0x370] sm:$0xff]  }
0x16e8   : > { %3906 = vmatprep.mubr.msk.bf16.mxu1 %vm4124_vm1, %v4123_v7  ;;  %3905 = vmatpush3.bf16.msra.mxu1 %v2793_v17  ;;  %v4058_v17 = vld [vmem:[%s4952_s1 + $0x350] sm:$0xff]  }
0x16e9   : > { %3916 = vmatprep.subr.bf16.mxu1 %v4123_v7 }
0x176c   : > { %v2589_v34 = vpop.f32.mrf.mxu0 }
0x176d   : > { %v2739_v25 = vpack.c.bf16 %v2589_v34, %v2589_v34 }
0x176e   : > { %v3878_v27 = vpop.f32.mrf.mxu0  ;;  %v2637_v28 = vpop.f32.mrf.mxu1 }
0x176f   : > { %v2740_v29 = vpack.c.bf16 %v2637_v28, %v2637_v28  ;;  %3901 = vmatmul.mubr.msk.bf16.vlgmr.msra.gmra.mxu0 %vm550_vm4, %v2739_v25 }
0x1770   : > { %v2592_v15 = vpop.f32.mrf.mxu0  ;;  %v3884_v31 = vpop.f32.mrf.mxu1  ;;  %3911 = vmatpush3.bf16.msra.mxu0 %v2839_v26  ;;  %3912 = vmatprep.mubr.msk.bf16.mxu0 %vm4124_vm1, %v4123_v7 }
0x1771   : > { %3907 = vmatmul.mubr.msk.bf16.vlgmr.msra.gmra.mxu1 %vm550_vm4, %v2740_v29  ;;  %3922 = vmatprep.subr.bf16.mxu0 %v4123_v7  ;;  %v3404_v15 = vld [vmem:[%s4953_s2 + $0x1c] ss:$0 sm:$0xff] }
0x1772   : > { %v3879_v32 = vpop.f32.mrf.mxu0  ;;  %v2640_v33 = vpop.f32.mrf.mxu1  ;;  %3917 = vmatpush3.bf16.msra.mxu1 %v2885_v30  ;;  %3918 = vmatprep.mubr.msk.bf16.mxu1 %vm4124_vm1, %v4123_v7 }
0x1773   : > { %3942 = vmatprep.subr.bf16.mxu1 %v4123_v7  ;;  %v3405_v32 = vld [vmem:[%s4953_s2 + $0x1d] ss:$0 sm:$0xff] }
0x1774   : > { %v3885_v35 = vpop.f32.mrf.mxu1 }
0x1776   : > { %v2685_v36 = vpop.f32.mrf.mxu0 }
0x1777   : > { %v2741_v37 = vpack.c.bf16 %v2685_v36, %v2685_v36 }
0x1778   : > { %v3890_v38 = vpop.f32.mrf.mxu0 }
0x1779   : > { %3913 = vmatmul.mubr.msk.bf16.vlgmr.msra.gmra.mxu0 %vm550_vm4, %v2741_v37  ;;  %v4059_v37 = vld [vmem:[%s4952_s1 + $0x348] sm:$0xff]   ;;  %v4060_v38 = vld [vmem:[%s4952_s1 + $0x340] sm:$0xff]  }
0x177a   : > { %v2688_v39 = vpop.f32.mrf.mxu0  ;;  %3938 = vmatprep.mubr.msk.bf16.mxu0 %vm4124_vm1, %v4123_v7  ;;  %3923 = vmatpush3.bf16.msra.mxu0 %v4045_v45 }
0x177b   : > { %3924 = vmatprep.subr.bf16.mxu0 %v4123_v7  ;;  %v3406_v39 = vld [vmem:[%s4953_s2 + $0x21] ss:$0 sm:$0xff] }
0x177c   : > { %v3891_v40 = vpop.f32.mrf.mxu0 }
0x177e   : > { %3925 = vmatpush3.bf16.msra.mxu0 %v4046_v10 }
0x177f   : > { %3926 = vmatprep.subr.bf16.mxu0 %v4123_v7 }
0x17a7   : > { %v2733_v0 = vpop.f32.mrf.mxu1 }
0x17a8   : > { %v2742_v41 = vpack.c.bf16 %v2733_v0, %v2733_v0 }
0x17a9   : > { %v3896_v42 = vpop.f32.mrf.mxu1 }
0x17aa   : > { %3919 = vmatmul.mubr.msk.bf16.vlgmr.msra.gmra.mxu1 %vm550_vm4, %v2742_v41 }
0x17ab   : > { %v2736_v43 = vpop.f32.mrf.mxu1  ;;  %3958 = vmatprep.mubr.msk.bf16.mxu1 %vm4124_vm1, %v4123_v7  ;;  %3943 = vmatpush3.bf16.msra.mxu1 %v4053_v16 }
0x17ac   : > { %3944 = vmatprep.subr.bf16.mxu1 %v4123_v7 }
0x17ad   : > { %v3897_v44 = vpop.f32.mrf.mxu1 }
0x17af   : > { %3945 = vmatpush3.bf16.msra.mxu1 %v4054_v18 }
0x17b0   : > { %3946 = vmatprep.subr.bf16.mxu1 %v4123_v7 }
0x17b3   : > { %3947 = vmatpush3.bf16.msra.mxu1 %v4055_v19 }
0x17b4   : > { %3948 = vmatprep.subr.bf16.mxu1 %v4123_v7 }
0x17b7   : > { %3949 = vmatpush3.bf16.msra.mxu1 %v4056_v20 }
0x17b8   : > { %3950 = vmatprep.subr.bf16.mxu1 %v4123_v7 }
0x17bb   : > { %3951 = vmatpush3.bf16.msra.mxu1 %v4057_v21 }
0x17bc   : > { %3952 = vmatprep.subr.bf16.mxu1 %v4123_v7 }
0x17bf   : > { %3953 = vmatpush3.bf16.msra.mxu1 %v4058_v17 }
0x17c0   : > { %3954 = vmatprep.subr.bf16.mxu1 %v4123_v7 }
0x17c3   : > { %3955 = vmatpush3.bf16.msra.mxu1 %v4059_v37 }
0x17c4   : > { %3956 = vmatprep.subr.bf16.mxu1 %v4123_v7 }
0x17c7   : > { %3957 = vmatpush3.bf16.msra.mxu1 %v4060_v38 }
0x182f   : > { %v2783_v46 = vpop.f32.mrf.mxu0 }
0x1831   : > { %v3902_v48 = vpop.f32.mrf.mxu0  ;;  %v2829_v49 = vpop.f32.mrf.mxu1 }
0x1832   : > { %v2927_v60 = vadd.f32 %v2829_v49, %v2783_v46 }
0x1833   : > { %v2786_v50 = vpop.f32.mrf.mxu0  ;;  %v3908_v51 = vpop.f32.mrf.mxu1 }
0x1835   : > { %v3903_v52 = vpop.f32.mrf.mxu0  ;;  %v2832_v53 = vpop.f32.mrf.mxu1 }
0x1837   : > { %v3909_v54 = vpop.f32.mrf.mxu1 }
0x1839   : > { %v2875_v55 = vpop.f32.mrf.mxu0 }
0x183a   : > { %v2928_v58 = vadd.f32 %v2927_v60, %v2875_v55 }
0x183b   : > { %v3914_v56 = vpop.f32.mrf.mxu0 }
0x183d   : > { %v2878_v57 = vpop.f32.mrf.mxu0 }
0x183f   : > { %v3915_v59 = vpop.f32.mrf.mxu0 }
0x186a   : > { %v2921_v61 = vpop.f32.mrf.mxu1 }
0x186b   : > { %v2929_v62 = vadd.f32 %v2928_v58, %v2921_v61 }
0x186c   : > { %v3920_v1 = vpop.f32.mrf.mxu1 }
0x186d   : > { %v2930_v2 = vadd.f32 %v2929_v62, %v4694_v24  ;;  %v4047_v24 = vld [vmem:[%s4952_s1 + $0x328] sm:$0xff]  }
0x186e   : > { %v2924_v4 = vpop.f32.mrf.mxu1  ;;  %3927 = vmatpush3.bf16.msra.mxu0 %v4047_v24 }
0x186f   : > { %v4864_v3 = vadd.f32 %v3403_v63, %v2930_v2  ;;  %3928 = vmatprep.subr.bf16.mxu0 %v4123_v7 }
0x1870   : > { %v3921_v6 = vpop.f32.mrf.mxu1 }
0x1871   : > { %v2939_v8 = vsel %vm209_vm0, %v4864_v3, 0.0  ;;  %v2943_v9 = vmul.f32 %v4864_v3, %v4864_v3 }
0x1872   : > { %2940 = vadd.xlane.f32.xlu0 %v2939_v8  ;;  %3929 = vmatpush3.bf16.msra.mxu0 %v4048_v47 }
0x1873   : > { %v2944_v5 = vsel %vm209_vm0, %v2943_v9, 0.0  ;;  %3930 = vmatprep.subr.bf16.mxu0 %v4123_v7 }
0x1874   : > { %2945 = vadd.xlane.f32.xlu1 %v2944_v5 }
0x1876   : > { %3931 = vmatpush3.bf16.msra.mxu0 %v4049_v11 }
0x1877   : > { %3932 = vmatprep.subr.bf16.mxu0 %v4123_v7 }
0x187a   : > { %3933 = vmatpush3.bf16.msra.mxu0 %v4050_v12 }
0x187b   : > { %3934 = vmatprep.subr.bf16.mxu0 %v4123_v7 }
0x187e   : > { %3935 = vmatpush3.bf16.msra.mxu0 %v4051_v13 }
0x187f   : > { %3936 = vmatprep.subr.bf16.mxu0 %v4123_v7  ;;  %v3423_v7 = vld [vmem:[%s4953_s2 + $0x20] ss:$0 sm:$0xff] }
0x1882   : > { %3937 = vmatpush3.bf16.msra.mxu0 %v4052_v14 }
0x18fb   : > { %v2941_v22 = vpop.xlane.xlu0 %2940 }
0x18fc   : > { %v2942_v34 = vmul.f32 0.03125, %v2941_v22 }
0x18fd   : > { %v2946_v23 = vpop.xlane.xlu1 %2945 }
0x18fe   : > { %v2948_v25 = vmul.f32 %v2942_v34, %v2942_v34  ;;  %v2947_v26 = vmul.f32 0.03125, %v2946_v23  ;;  %v2950_v29 = vsub.f32 %v4864_v3, %v2942_v34 }
0x1900   : > { %v2949_v27 = vsub.f32 %v2947_v26, %v2948_v25 }
0x1902   : > { %v2951_v28 = vadd.f32 1e-05, %v2949_v27 }
0x1904   : > { %4113 = vrsqrt.f32 %v2951_v28 }
0x1911   : > { %v4114_v30 = vpop.eup %4113 }
0x1912   : > { %v2953_v31 = vmul.f32 %v4114_v30, %v2950_v29 }
0x1914   : > { %v2958_v33 = vmul.f32 %v3404_v15, %v2953_v31 }
0x1916   : > { %v2963_v35 = vadd.f32 %v3405_v32, %v2958_v33 }
0x1918   : > { %v2980_v36 = vpack.c.bf16 %v2963_v35, %v2963_v35 }
0x191a   : > { %3939 = vmatmul.mubr.bf16.vlgmr.msra.gmra.mxu0 %v2980_v36 }
0x19da   : > { %v3068_v40 = vpop.f32.mrf.mxu0 }
0x19db   : > { %v3069_v0 = vadd.f32 %v3406_v39, %v3068_v40 }
0x19dc   : > { %v3940_v41 = vpop.f32.mrf.mxu0 }
0x19dd   : > { %v3074_v42 = vmax.f32 %v3069_v0, 0.0 }
0x19de   : > { %v3071_v43 = vpop.f32.mrf.mxu0 }
0x19df   : > { %v3091_v44 = vpack.c.bf16 %v3074_v42, %v3074_v42 }
0x19e0   : > { %v3941_v45 = vpop.f32.mrf.mxu0 }
0x19e1   : > { %3959 = vmatmul.mubr.bf16.vlgmr.msra.gmra.mxu1 %v3091_v44 }
0x1aa1   : > { %v3174_v46 = vpop.f32.mrf.mxu1 }
0x1aa2   : > { %v3180_v48 = vadd.f32 %v3174_v46, %v4864_v3 }
0x1aa3   : > { %v3960_v49 = vpop.f32.mrf.mxu1 }
0x1aa4   : > { %v3186_v50 = vadd.f32 %v3423_v7, %v3180_v48 }
0x1aa5   : > { %v3177_v51 = vpop.f32.mrf.mxu1 }
0x1aa6   : > { %3187 = vst [vmem:[%s199_s20] sm:$0xf] %v3186_v50 }
0x1aa7   : > { %v3961_v52 = vpop.f32.mrf.mxu1 }
0x1aa8 PF: > { %s15_s15 = sadd.s32 1, %s4121_s15  }
0x1aa9   : > { %p12_p4 = scmp.ge.s32.totalorder %s15_s15, 4  }
0x1aab   :  { %14 = sbr.rel (!%p12_p4) target bundleno = 1 (0x1), region = 74 }

</bundles_post_ra>
